<compile_context>
chip_gen: v6e
topology: v6e:2x2x1
jax: 0.10.0
libtpu: 0.0.40
codegen_flags: <defaults>
</compile_context>

<pallas_src>
import functools
import jax
import jax.numpy as jnp
from jax import lax
from jax.experimental import pallas as pl
from jax.experimental.pallas import tpu as pltpu


# ----------------------------------------------------------------------------
# Fused kernel: depth x GRU message passing + readout.
# ----------------------------------------------------------------------------
def mpn_fused_kernel(fnode_ref, fmess_ref, agraph_ref, bgraph_ref,
                     wx_ref,                    # [F, 3H] bf16 = [W_r|W_z_x|W_h_x]
                     wzh_ref, bz_ref,           # [H, H] bf16, [1, H] f32
                     ur_ref, bur_ref,           # [H, H] bf16, [1, H] f32
                     whh_ref, bh_ref,           # [H, H] bf16, [1, H] f32
                     won_ref, wom_ref, bo_ref,  # [Fn,H] bf16, [H,H] bf16, [1,H] f32
                     nh_ref, h_out_ref,         # outputs [N, H], [E, H] f32
                     *, depth):
    E, F = fmess_ref.shape
    N = fnode_ref.shape[0]
    MAX_NB = bgraph_ref.shape[1]
    H = ur_ref.shape[0]                         # lane-padded hidden (mult of 128)
    bf16 = jnp.bfloat16
    f32 = jnp.float32

    bg = bgraph_ref[...]                        # [E, MAX_NB] int32
    ag = agraph_ref[...]                        # [N, MAX_NB] int32

    # ---------------- depth-invariant work, hoisted out of the loop ----------
    # Fused x-projection: one [E, F] x [F, 3H] bf16 matmul, f32 accumulate.
    xw = jnp.dot(fmess_ref[...].astype(bf16), wx_ref[...],
                 preferred_element_type=f32)                       # [E, 3H]
    wr_xb = xw[:, 0:H] + bur_ref[...]            # W_r(x)   + b_Ur
    wz_xb = xw[:, H:2 * H] + bz_ref[...]         # W_z_x(x) + b_z
    wh_xb = xw[:, 2 * H:3 * H] + bh_ref[...]     # W_h_x(x) + b_h

    # Stacked one-hot gather matrix (bf16; 0/1 exact). Row (k*E + i) selects
    # h[bgraph[i, k]].  Column 0 is forced to zero so gathers of the padding
    # message (index 0) are exactly zero -> no per-step msg_mask needed.
    col_e = lax.broadcasted_iota(jnp.int32, (E, E), 1)
    G = jnp.concatenate(
        [((col_e == bg[:, k:k + 1]) & (bg[:, k:k + 1] != 0)).astype(bf16)
         for k in range(MAX_NB)], axis=0)                          # [MAX_NB*E, E]

    # Summed one-hot for the readout gather (column 0 zeroed likewise).
    # Counts are small integers -> exact in bf16.
    col_n = lax.broadcasted_iota(jnp.int32, (N, E), 1)
    s_a = jnp.zeros((N, E), f32)
    for k in range(MAX_NB):
        s_a = s_a + ((col_n == ag[:, k:k + 1])
                     & (ag[:, k:k + 1] != 0)).astype(f32)
    s_a = s_a.astype(bf16)                                         # [N, E]

    ur = ur_ref[...]
    wzh = wzh_ref[...]
    whh = whh_ref[...]

    # ---------------- GRU message-passing recurrence --------------------------
    def gru_step(_, h):
        h_bf = h.astype(bf16)
        # Gather all MAX_NB neighbor hidden states in one MXU pass.
        hn = jnp.dot(G, h_bf, preferred_element_type=f32)          # [MAX_NB*E, H]
        # U_r on the stacked block in one MXU pass.
        rpre = jnp.dot(hn.astype(bf16), ur, preferred_element_type=f32)
        # Per-slot accumulation (static sublane slices) -- no wr_xb_all tile,
        # no full [MAX_NB*E, H] gated temporary.
        sum_h = jnp.zeros((E, H), f32)
        sum_g = jnp.zeros((E, H), f32)
        for k in range(MAX_NB):
            hk = hn[k * E:(k + 1) * E, :]
            rk = jax.nn.sigmoid(wr_xb + rpre[k * E:(k + 1) * E, :])
            sum_h = sum_h + hk
            sum_g = sum_g + rk * hk
        z = jax.nn.sigmoid(
            wz_xb + jnp.dot(sum_h.astype(bf16), wzh, preferred_element_type=f32))
        pre_h = jnp.tanh(
            wh_xb + jnp.dot(sum_g.astype(bf16), whh, preferred_element_type=f32))
        return (1.0 - z) * sum_h + z * pre_h     # dropout = identity (eval mode)

    h_fin = lax.fori_loop(0, depth, gru_step, jnp.zeros((E, H), f32),
                          unroll=True)

    # Zero the padding-message row ONCE (instead of per step).
    msg_mask = (lax.broadcasted_iota(jnp.int32, (E, H), 0) != 0).astype(f32)
    h_fin = h_fin * msg_mask

    # ---------------- readout --------------------------------------------------
    nei = jnp.dot(s_a, h_fin.astype(bf16), preferred_element_type=f32)   # [N, H]
    pre = (jnp.dot(fnode_ref[...].astype(bf16), won_ref[...],
                   preferred_element_type=f32)
           + jnp.dot(nei.astype(bf16), wom_ref[...], preferred_element_type=f32)
           + bo_ref[...])
    node_mask = (lax.broadcasted_iota(jnp.int32, (N, H), 0) != 0).astype(f32)
    nh_ref[...] = (jnp.maximum(pre, 0.0) * node_mask).astype(nh_ref.dtype)
    h_out_ref[...] = h_fin.astype(h_out_ref.dtype)


# ----------------------------------------------------------------------------
# One-time parameter preparation (fuse, lane-pad, cast MXU operands to bf16).
# Zero-padding the hidden dim is exact: padded columns stay 0 through the
# recurrence and readout, and are sliced off in the wrapper.
# ----------------------------------------------------------------------------
def prepare_params(params, hsize):
    H = hsize
    Hp = ((H + 127) // 128) * 128

    def pad_c(w):                       # pad output (lane) dim
        return jnp.pad(w, ((0, 0), (0, Hp - H)))

    def pad_rc(w):                      # pad both dims of [H, H] weights
        return jnp.pad(w, ((0, Hp - H), (0, Hp - H)))

    wx = jnp.concatenate(
        [pad_c(params["w_r"]), pad_c(params["wz_x"]), pad_c(params["wh_x"])],
        axis=1)
    return {
        "wx": wx.astype(jnp.bfloat16),                    # [F, 3Hp]
        "wzh": pad_rc(params["wz_h"]).astype(jnp.bfloat16),
        "ur": pad_rc(params["u_r"]).astype(jnp.bfloat16),
        "whh": pad_rc(params["wh_h"]).astype(jnp.bfloat16),
        "won": pad_c(params["wo_n"]).astype(jnp.bfloat16),
        "wom": pad_rc(params["wo_m"]).astype(jnp.bfloat16),
        "b_z": pad_c(params["b_z"]),                      # biases stay f32
        "b_ur": pad_c(params["b_ur"]),
        "b_h": pad_c(params["b_h"]),
        "b_o": pad_c(params["b_o"]),
    }


# ----------------------------------------------------------------------------
# Wrapper
# ----------------------------------------------------------------------------
@functools.partial(jax.jit, static_argnames=("depth", "hsize"))
def mpn_layer_forward(fnode, fmess, agraph, bgraph, prepared, depth, hsize):
    E, F = fmess.shape
    N, Fn = fnode.shape
    Hp = prepared["ur"].shape[0]
    MAX_NB = bgraph.shape[1]

    operands = (fnode, fmess, agraph, bgraph,
                prepared["wx"],
                prepared["wzh"], prepared["b_z"],
                prepared["ur"], prepared["b_ur"],
                prepared["whh"], prepared["b_h"],
                prepared["won"], prepared["wom"], prepared["b_o"])

    # Advisory cost estimate for XLA scheduling.
    flops = int(
        2 * E * F * 3 * Hp
        + depth * (2 * MAX_NB * E * E * Hp       # stacked gather matmul
                   + 2 * MAX_NB * E * Hp * Hp    # r-gate U_r
                   + 2 * E * Hp * Hp             # z-gate W_z_h
                   + 2 * E * Hp * Hp)            # candidate W_h_h
        + 2 * N * E * Hp + 2 * N * Fn * Hp + 2 * N * Hp * Hp)
    transcendentals = int(depth * (MAX_NB * E * Hp + 2 * E * Hp))
    bytes_accessed = int(sum(int(a.size) * a.dtype.itemsize for a in operands)
                         + 4 * (N + E) * Hp)
    cost = pl.CostEstimate(flops=flops, transcendentals=transcendentals,
                           bytes_accessed=bytes_accessed)

    # Scoped-VMEM budget sized from the resident set (default scoped cap is
    # only 16/32 MiB); keep it <= 56 MiB so it stays legal on v7x (64 MiB VMEM).
    resident = (
        2 * MAX_NB * E * E                       # G (bf16)
        + 2 * N * E                              # S_a (bf16)
        + 4 * (2 * MAX_NB * E * Hp)              # hn + rpre (f32)
        + 4 * (8 * E * Hp)                       # xw, biases-added x-proj, h, sums
        + 4 * (2 * (N + E) * Hp)                 # outputs (double-buffered)
        + 2 * sum(int(a.size) * a.dtype.itemsize for a in operands)
        + 4 * (N + E) * Hp)                      # row-0 masks
    vmem_limit = int(min(max(2 * resident + (4 << 20), 32 << 20), 56 << 20))

    vmem = pl.BlockSpec(memory_space=pltpu.MemorySpace.VMEM)
    nh, h = pl.pallas_call(
        functools.partial(mpn_fused_kernel, depth=depth),
        out_shape=(jax.ShapeDtypeStruct((N, Hp), jnp.float32),
                   jax.ShapeDtypeStruct((E, Hp), jnp.float32)),
        in_specs=[vmem] * len(operands),
        out_specs=(vmem, vmem),
        cost_estimate=cost,
        compiler_params=pltpu.CompilerParams(vmem_limit_bytes=vmem_limit),
    )(*operands)
    # Slice the lane padding back off.
    return nh[:, :hsize], h[:, :hsize]


# ----------------------------------------------------------------------------
# Pure-JAX f32 reference (mirrors the PyTorch code) for a correctness check
# ----------------------------------------------------------------------------
def reference(fnode, fmess, agraph, bgraph, p, depth):
    E = fmess.shape[0]
    N = fnode.shape[0]
    H = p["u_r"].shape[0]
    h = jnp.zeros((E, H), jnp.float32)
    msg_mask = jnp.ones((E, 1), jnp.float32).at[0, 0].set(0.0)
    for _ in range(depth):
        h_nei = h[bgraph]                                  # [E, MAX_NB, H]
        sum_h = h_nei.sum(axis=1)
        z = jax.nn.sigmoid(fmess @ p["wz_x"] + sum_h @ p["wz_h"] + p["b_z"])
        r1 = (fmess @ p["w_r"])[:, None, :]
        r2 = h_nei @ p["u_r"] + p["b_ur"]
        r = jax.nn.sigmoid(r1 + r2)
        sum_gated = (r * h_nei).sum(axis=1)
        pre_h = jnp.tanh(fmess @ p["wh_x"] + sum_gated @ p["wh_h"] + p["b_h"])
        h = ((1.0 - z) * sum_h + z * pre_h) * msg_mask
    nei = h[agraph].sum(axis=1)
    node_mask = jnp.ones((N, 1), jnp.float32).at[0, 0].set(0.0)
    node_hiddens = jax.nn.relu(fnode @ p["wo_n"] + nei @ p["wo_m"] + p["b_o"])
    return node_hiddens * node_mask, h


# ----------------------------------------------------------------------------
# Deterministic parameter init (PyTorch nn.Linear-like uniform(-1/sqrt(fan_in)))
# ----------------------------------------------------------------------------
def init_params(key, node_fdim, edge_fdim, hsize):
    F = node_fdim + edge_fdim
    H = hsize

    def lin(key, fan_in, shape):
        bound = 1.0 / jnp.sqrt(fan_in)
        return jax.random.uniform(key, shape, jnp.float32, -bound, bound)

    ks = jax.random.split(key, 12)
    return {
        "wz_x": lin(ks[0], F + H, (F, H)),
        "wz_h": lin(ks[1], F + H, (H, H)),
        "b_z":  lin(ks[2], F + H, (1, H)),
        "w_r":  lin(ks[3], F, (F, H)),
        "u_r":  lin(ks[4], H, (H, H)),
        "b_ur": lin(ks[5], H, (1, H)),
        "wh_x": lin(ks[6], F + H, (F, H)),
        "wh_h": lin(ks[7], F + H, (H, H)),
        "b_h":  lin(ks[8], F + H, (1, H)),
        "wo_n": lin(ks[9], node_fdim + H, (node_fdim, H)),
        "wo_m": lin(ks[10], node_fdim + H, (H, H)),
        "b_o":  lin(ks[11], node_fdim + H, (1, H)),
    }


if __name__ == "__main__":
    node_fdim, edge_fdim = 8, 8
    hsize, depth = 32, 3
    N, E, MAX_NB = 16, 16, 4

    key = jax.random.PRNGKey(0)
    k_p, k_fn, k_fm, k_ag, k_bg = jax.random.split(key, 5)

    params = init_params(k_p, node_fdim, edge_fdim, hsize)
    fnode = jax.random.normal(k_fn, (N, node_fdim), jnp.float32)
    fmess = jax.random.normal(k_fm, (E, node_fdim + edge_fdim), jnp.float32)
    agraph = jax.random.randint(k_ag, (N, MAX_NB), 0, E, jnp.int32)
    bgraph = jax.random.randint(k_bg, (E, MAX_NB), 0, E, jnp.int32)

    prepared = prepare_params(params, hsize)     # one-time weight prep
    node_hiddens, h = mpn_layer_forward(fnode, fmess, agraph, bgraph,
                                        prepared, depth, hsize)
    jax.block_until_ready((node_hiddens, h))

    ref_nh, ref_h = reference(fnode, fmess, agraph, bgraph, params, depth)
    # bf16 MXU operands (weights / gather matrices / dot inputs) introduce
    # ~1e-3 relative error vs the f32 reference -> deliberately relaxed tol.
    assert jnp.allclose(node_hiddens, ref_nh, atol=5e-2, rtol=5e-2), \
        float(jnp.max(jnp.abs(node_hiddens - ref_nh)))
    assert jnp.allclose(h, ref_h, atol=5e-2, rtol=5e-2), \
        float(jnp.max(jnp.abs(h - ref_h)))

    print("KERNEL_OK")
</pallas_src>

<mosaic_0001>
module attributes {stable_mosaic.version = 11 : i64} {
  func.func @mpn_fused_kernel(%arg0: memref<16x8xf32, #tpu.memory_space<vmem>>, %arg1: memref<16x16xf32, #tpu.memory_space<vmem>>, %arg2: memref<16x4xi32, #tpu.memory_space<vmem>>, %arg3: memref<16x4xi32, #tpu.memory_space<vmem>>, %arg4: memref<16x384xbf16, #tpu.memory_space<vmem>>, %arg5: memref<128x128xbf16, #tpu.memory_space<vmem>>, %arg6: memref<1x128xf32, #tpu.memory_space<vmem>>, %arg7: memref<128x128xbf16, #tpu.memory_space<vmem>>, %arg8: memref<1x128xf32, #tpu.memory_space<vmem>>, %arg9: memref<128x128xbf16, #tpu.memory_space<vmem>>, %arg10: memref<1x128xf32, #tpu.memory_space<vmem>>, %arg11: memref<8x128xbf16, #tpu.memory_space<vmem>>, %arg12: memref<128x128xbf16, #tpu.memory_space<vmem>>, %arg13: memref<1x128xf32, #tpu.memory_space<vmem>>, %arg14: memref<16x128xf32, #tpu.memory_space<vmem>>, %arg15: memref<16x128xf32, #tpu.memory_space<vmem>>) attributes {dimension_semantics = [], scalar_prefetch = 0 : i64, scratch_operands = 0 : i64, tpu.core_type = #tpu.core_type<tc>} {
    %c0 = arith.constant 0 : index
    %c0_0 = arith.constant 0 : index
    %0 = vector.load %arg3[%c0, %c0_0] : memref<16x4xi32, #tpu.memory_space<vmem>>, vector<16x4xi32>
    %c0_1 = arith.constant 0 : index
    %c0_2 = arith.constant 0 : index
    %1 = vector.load %arg2[%c0_1, %c0_2] : memref<16x4xi32, #tpu.memory_space<vmem>>, vector<16x4xi32>
    %c0_3 = arith.constant 0 : index
    %c0_4 = arith.constant 0 : index
    %2 = vector.load %arg1[%c0_3, %c0_4] : memref<16x16xf32, #tpu.memory_space<vmem>>, vector<16x16xf32>
    %3 = arith.truncf %2 : vector<16x16xf32> to vector<16x16xbf16>
    %c0_5 = arith.constant 0 : index
    %c0_6 = arith.constant 0 : index
    %4 = vector.load %arg4[%c0_5, %c0_6] : memref<16x384xbf16, #tpu.memory_space<vmem>>, vector<16x384xbf16>
    %cst = arith.constant dense<0.000000e+00> : vector<16x384xf32>
    %5 = tpu.matmul %3, %4, %cst {dimension_numbers = #tpu.dot_dimension_numbers<[1], [0], [0], [1], [0, 0, 1, 1], [], []>} : vector<16x16xbf16>, vector<16x384xbf16>, vector<16x384xf32> -> vector<16x384xf32>
    %6 = vector.extract_strided_slice %5 {offsets = [0, 0], sizes = [16, 128], strides = [1, 1]} : vector<16x384xf32> to vector<16x128xf32>
    %c0_7 = arith.constant 0 : index
    %c0_8 = arith.constant 0 : index
    %7 = vector.load %arg8[%c0_7, %c0_8] : memref<1x128xf32, #tpu.memory_space<vmem>>, vector<1x128xf32>
    %8 = vector.broadcast %7 : vector<1x128xf32> to vector<16x128xf32>
    %9 = arith.addf %6, %8 : vector<16x128xf32>
    %10 = vector.extract_strided_slice %5 {offsets = [0, 128], sizes = [16, 128], strides = [1, 1]} : vector<16x384xf32> to vector<16x128xf32>
    %c0_9 = arith.constant 0 : index
    %c0_10 = arith.constant 0 : index
    %11 = vector.load %arg6[%c0_9, %c0_10] : memref<1x128xf32, #tpu.memory_space<vmem>>, vector<1x128xf32>
    %12 = vector.broadcast %11 : vector<1x128xf32> to vector<16x128xf32>
    %13 = arith.addf %10, %12 : vector<16x128xf32>
    %14 = vector.extract_strided_slice %5 {offsets = [0, 256], sizes = [16, 128], strides = [1, 1]} : vector<16x384xf32> to vector<16x128xf32>
    %c0_11 = arith.constant 0 : index
    %c0_12 = arith.constant 0 : index
    %15 = vector.load %arg10[%c0_11, %c0_12] : memref<1x128xf32, #tpu.memory_space<vmem>>, vector<1x128xf32>
    %16 = vector.broadcast %15 : vector<1x128xf32> to vector<16x128xf32>
    %17 = arith.addf %14, %16 : vector<16x128xf32>
    %18 = tpu.iota {dimensions = array<i32: 1>} : vector<16x16xi32>
    %19 = vector.extract_strided_slice %0 {offsets = [0, 0], sizes = [16, 1], strides = [1, 1]} : vector<16x4xi32> to vector<16x1xi32>
    %20 = vector.broadcast %19 : vector<16x1xi32> to vector<16x16xi32>
    %21 = arith.cmpi eq, %18, %20 : vector<16x16xi32>
    %22 = vector.extract_strided_slice %0 {offsets = [0, 0], sizes = [16, 1], strides = [1, 1]} : vector<16x4xi32> to vector<16x1xi32>
    %c0_i32 = arith.constant 0 : i32
    %23 = vector.broadcast %c0_i32 : i32 to vector<16x1xi32>
    %24 = arith.cmpi ne, %22, %23 : vector<16x1xi32>
    %25 = vector.broadcast %24 : vector<16x1xi1> to vector<16x16xi1>
    %26 = arith.andi %21, %25 : vector<16x16xi1>
    %27 = arith.extui %26 : vector<16x16xi1> to vector<16x16xi32>
    %28 = arith.sitofp %27 : vector<16x16xi32> to vector<16x16xf32>
    %29 = arith.truncf %28 : vector<16x16xf32> to vector<16x16xbf16>
    %30 = vector.extract_strided_slice %0 {offsets = [0, 1], sizes = [16, 1], strides = [1, 1]} : vector<16x4xi32> to vector<16x1xi32>
    %31 = vector.broadcast %30 : vector<16x1xi32> to vector<16x16xi32>
    %32 = arith.cmpi eq, %18, %31 : vector<16x16xi32>
    %33 = vector.extract_strided_slice %0 {offsets = [0, 1], sizes = [16, 1], strides = [1, 1]} : vector<16x4xi32> to vector<16x1xi32>
    %c0_i32_13 = arith.constant 0 : i32
    %34 = vector.broadcast %c0_i32_13 : i32 to vector<16x1xi32>
    %35 = arith.cmpi ne, %33, %34 : vector<16x1xi32>
    %36 = vector.broadcast %35 : vector<16x1xi1> to vector<16x16xi1>
    %37 = arith.andi %32, %36 : vector<16x16xi1>
    %38 = arith.extui %37 : vector<16x16xi1> to vector<16x16xi32>
    %39 = arith.sitofp %38 : vector<16x16xi32> to vector<16x16xf32>
    %40 = arith.truncf %39 : vector<16x16xf32> to vector<16x16xbf16>
    %41 = vector.extract_strided_slice %0 {offsets = [0, 2], sizes = [16, 1], strides = [1, 1]} : vector<16x4xi32> to vector<16x1xi32>
    %42 = vector.broadcast %41 : vector<16x1xi32> to vector<16x16xi32>
    %43 = arith.cmpi eq, %18, %42 : vector<16x16xi32>
    %44 = vector.extract_strided_slice %0 {offsets = [0, 2], sizes = [16, 1], strides = [1, 1]} : vector<16x4xi32> to vector<16x1xi32>
    %c0_i32_14 = arith.constant 0 : i32
    %45 = vector.broadcast %c0_i32_14 : i32 to vector<16x1xi32>
    %46 = arith.cmpi ne, %44, %45 : vector<16x1xi32>
    %47 = vector.broadcast %46 : vector<16x1xi1> to vector<16x16xi1>
    %48 = arith.andi %43, %47 : vector<16x16xi1>
    %49 = arith.extui %48 : vector<16x16xi1> to vector<16x16xi32>
    %50 = arith.sitofp %49 : vector<16x16xi32> to vector<16x16xf32>
    %51 = arith.truncf %50 : vector<16x16xf32> to vector<16x16xbf16>
    %52 = vector.extract_strided_slice %0 {offsets = [0, 3], sizes = [16, 1], strides = [1, 1]} : vector<16x4xi32> to vector<16x1xi32>
    %53 = vector.broadcast %52 : vector<16x1xi32> to vector<16x16xi32>
    %54 = arith.cmpi eq, %18, %53 : vector<16x16xi32>
    %55 = vector.extract_strided_slice %0 {offsets = [0, 3], sizes = [16, 1], strides = [1, 1]} : vector<16x4xi32> to vector<16x1xi32>
    %c0_i32_15 = arith.constant 0 : i32
    %56 = vector.broadcast %c0_i32_15 : i32 to vector<16x1xi32>
    %57 = arith.cmpi ne, %55, %56 : vector<16x1xi32>
    %58 = vector.broadcast %57 : vector<16x1xi1> to vector<16x16xi1>
    %59 = arith.andi %54, %58 : vector<16x16xi1>
    %60 = arith.extui %59 : vector<16x16xi1> to vector<16x16xi32>
    %61 = arith.sitofp %60 : vector<16x16xi32> to vector<16x16xf32>
    %62 = arith.truncf %61 : vector<16x16xf32> to vector<16x16xbf16>
    %63 = tpu.concatenate %29, %40, %51, %62 in 0 : vector<16x16xbf16>, vector<16x16xbf16>, vector<16x16xbf16>, vector<16x16xbf16> -> vector<64x16xbf16>
    %64 = tpu.iota {dimensions = array<i32: 1>} : vector<16x16xi32>
    %cst_16 = arith.constant 0.000000e+00 : f32
    %65 = vector.broadcast %cst_16 : f32 to vector<16x16xf32>
    %66 = vector.extract_strided_slice %1 {offsets = [0, 0], sizes = [16, 1], strides = [1, 1]} : vector<16x4xi32> to vector<16x1xi32>
    %67 = vector.broadcast %66 : vector<16x1xi32> to vector<16x16xi32>
    %68 = arith.cmpi eq, %64, %67 : vector<16x16xi32>
    %69 = vector.extract_strided_slice %1 {offsets = [0, 0], sizes = [16, 1], strides = [1, 1]} : vector<16x4xi32> to vector<16x1xi32>
    %c0_i32_17 = arith.constant 0 : i32
    %70 = vector.broadcast %c0_i32_17 : i32 to vector<16x1xi32>
    %71 = arith.cmpi ne, %69, %70 : vector<16x1xi32>
    %72 = vector.broadcast %71 : vector<16x1xi1> to vector<16x16xi1>
    %73 = arith.andi %68, %72 : vector<16x16xi1>
    %74 = arith.extui %73 : vector<16x16xi1> to vector<16x16xi32>
    %75 = arith.sitofp %74 : vector<16x16xi32> to vector<16x16xf32>
    %76 = arith.addf %65, %75 : vector<16x16xf32>
    %77 = vector.extract_strided_slice %1 {offsets = [0, 1], sizes = [16, 1], strides = [1, 1]} : vector<16x4xi32> to vector<16x1xi32>
    %78 = vector.broadcast %77 : vector<16x1xi32> to vector<16x16xi32>
    %79 = arith.cmpi eq, %64, %78 : vector<16x16xi32>
    %80 = vector.extract_strided_slice %1 {offsets = [0, 1], sizes = [16, 1], strides = [1, 1]} : vector<16x4xi32> to vector<16x1xi32>
    %c0_i32_18 = arith.constant 0 : i32
    %81 = vector.broadcast %c0_i32_18 : i32 to vector<16x1xi32>
    %82 = arith.cmpi ne, %80, %81 : vector<16x1xi32>
    %83 = vector.broadcast %82 : vector<16x1xi1> to vector<16x16xi1>
    %84 = arith.andi %79, %83 : vector<16x16xi1>
    %85 = arith.extui %84 : vector<16x16xi1> to vector<16x16xi32>
    %86 = arith.sitofp %85 : vector<16x16xi32> to vector<16x16xf32>
    %87 = arith.addf %76, %86 : vector<16x16xf32>
    %88 = vector.extract_strided_slice %1 {offsets = [0, 2], sizes = [16, 1], strides = [1, 1]} : vector<16x4xi32> to vector<16x1xi32>
    %89 = vector.broadcast %88 : vector<16x1xi32> to vector<16x16xi32>
    %90 = arith.cmpi eq, %64, %89 : vector<16x16xi32>
    %91 = vector.extract_strided_slice %1 {offsets = [0, 2], sizes = [16, 1], strides = [1, 1]} : vector<16x4xi32> to vector<16x1xi32>
    %c0_i32_19 = arith.constant 0 : i32
    %92 = vector.broadcast %c0_i32_19 : i32 to vector<16x1xi32>
    %93 = arith.cmpi ne, %91, %92 : vector<16x1xi32>
    %94 = vector.broadcast %93 : vector<16x1xi1> to vector<16x16xi1>
    %95 = arith.andi %90, %94 : vector<16x16xi1>
    %96 = arith.extui %95 : vector<16x16xi1> to vector<16x16xi32>
    %97 = arith.sitofp %96 : vector<16x16xi32> to vector<16x16xf32>
    %98 = arith.addf %87, %97 : vector<16x16xf32>
    %99 = vector.extract_strided_slice %1 {offsets = [0, 3], sizes = [16, 1], strides = [1, 1]} : vector<16x4xi32> to vector<16x1xi32>
    %100 = vector.broadcast %99 : vector<16x1xi32> to vector<16x16xi32>
    %101 = arith.cmpi eq, %64, %100 : vector<16x16xi32>
    %102 = vector.extract_strided_slice %1 {offsets = [0, 3], sizes = [16, 1], strides = [1, 1]} : vector<16x4xi32> to vector<16x1xi32>
    %c0_i32_20 = arith.constant 0 : i32
    %103 = vector.broadcast %c0_i32_20 : i32 to vector<16x1xi32>
    %104 = arith.cmpi ne, %102, %103 : vector<16x1xi32>
    %105 = vector.broadcast %104 : vector<16x1xi1> to vector<16x16xi1>
    %106 = arith.andi %101, %105 : vector<16x16xi1>
    %107 = arith.extui %106 : vector<16x16xi1> to vector<16x16xi32>
    %108 = arith.sitofp %107 : vector<16x16xi32> to vector<16x16xf32>
    %109 = arith.addf %98, %108 : vector<16x16xf32>
    %110 = arith.truncf %109 : vector<16x16xf32> to vector<16x16xbf16>
    %c0_21 = arith.constant 0 : index
    %c0_22 = arith.constant 0 : index
    %111 = vector.load %arg7[%c0_21, %c0_22] : memref<128x128xbf16, #tpu.memory_space<vmem>>, vector<128x128xbf16>
    %c0_23 = arith.constant 0 : index
    %c0_24 = arith.constant 0 : index
    %112 = vector.load %arg5[%c0_23, %c0_24] : memref<128x128xbf16, #tpu.memory_space<vmem>>, vector<128x128xbf16>
    %c0_25 = arith.constant 0 : index
    %c0_26 = arith.constant 0 : index
    %113 = vector.load %arg9[%c0_25, %c0_26] : memref<128x128xbf16, #tpu.memory_space<vmem>>, vector<128x128xbf16>
    %cst_27 = arith.constant 0.000000e+00 : f32
    %114 = vector.broadcast %cst_27 : f32 to vector<16x128xf32>
    %c0_i32_28 = arith.constant 0 : i32
    %115 = arith.truncf %114 : vector<16x128xf32> to vector<16x128xbf16>
    %cst_29 = arith.constant dense<0.000000e+00> : vector<64x128xf32>
    %116 = tpu.matmul %63, %115, %cst_29 {dimension_numbers = #tpu.dot_dimension_numbers<[1], [0], [0], [1], [0, 0, 1, 1], [], []>} : vector<64x16xbf16>, vector<16x128xbf16>, vector<64x128xf32> -> vector<64x128xf32>
    %117 = arith.truncf %116 : vector<64x128xf32> to vector<64x128xbf16>
    %cst_30 = arith.constant dense<0.000000e+00> : vector<64x128xf32>
    %118 = tpu.matmul %117, %111, %cst_30 {dimension_numbers = #tpu.dot_dimension_numbers<[1], [0], [0], [1], [0, 0, 1, 1], [], []>} : vector<64x128xbf16>, vector<128x128xbf16>, vector<64x128xf32> -> vector<64x128xf32>
    %cst_31 = arith.constant 0.000000e+00 : f32
    %119 = vector.broadcast %cst_31 : f32 to vector<16x128xf32>
    %cst_32 = arith.constant 0.000000e+00 : f32
    %120 = vector.broadcast %cst_32 : f32 to vector<16x128xf32>
    %121 = vector.extract_strided_slice %116 {offsets = [0, 0], sizes = [16, 128], strides = [1, 1]} : vector<64x128xf32> to vector<16x128xf32>
    %122 = vector.extract_strided_slice %118 {offsets = [0, 0], sizes = [16, 128], strides = [1, 1]} : vector<64x128xf32> to vector<16x128xf32>
    %123 = arith.addf %9, %122 : vector<16x128xf32>
    %124 = arith.negf %123 : vector<16x128xf32>
    %125 = math.exp %124 : vector<16x128xf32>
    %cst_33 = arith.constant 1.000000e+00 : f32
    %126 = vector.broadcast %cst_33 : f32 to vector<16x128xf32>
    %127 = arith.addf %126, %125 : vector<16x128xf32>
    %128 = arith.divf %126, %127 : vector<16x128xf32>
    %129 = arith.addf %119, %121 : vector<16x128xf32>
    %130 = arith.mulf %128, %121 : vector<16x128xf32>
    %131 = arith.addf %120, %130 : vector<16x128xf32>
    %132 = vector.extract_strided_slice %116 {offsets = [16, 0], sizes = [16, 128], strides = [1, 1]} : vector<64x128xf32> to vector<16x128xf32>
    %133 = vector.extract_strided_slice %118 {offsets = [16, 0], sizes = [16, 128], strides = [1, 1]} : vector<64x128xf32> to vector<16x128xf32>
    %134 = arith.addf %9, %133 : vector<16x128xf32>
    %135 = arith.negf %134 : vector<16x128xf32>
    %136 = math.exp %135 : vector<16x128xf32>
    %cst_34 = arith.constant 1.000000e+00 : f32
    %137 = vector.broadcast %cst_34 : f32 to vector<16x128xf32>
    %138 = arith.addf %137, %136 : vector<16x128xf32>
    %139 = arith.divf %137, %138 : vector<16x128xf32>
    %140 = arith.addf %129, %132 : vector<16x128xf32>
    %141 = arith.mulf %139, %132 : vector<16x128xf32>
    %142 = arith.addf %131, %141 : vector<16x128xf32>
    %143 = vector.extract_strided_slice %116 {offsets = [32, 0], sizes = [16, 128], strides = [1, 1]} : vector<64x128xf32> to vector<16x128xf32>
    %144 = vector.extract_strided_slice %118 {offsets = [32, 0], sizes = [16, 128], strides = [1, 1]} : vector<64x128xf32> to vector<16x128xf32>
    %145 = arith.addf %9, %144 : vector<16x128xf32>
    %146 = arith.negf %145 : vector<16x128xf32>
    %147 = math.exp %146 : vector<16x128xf32>
    %cst_35 = arith.constant 1.000000e+00 : f32
    %148 = vector.broadcast %cst_35 : f32 to vector<16x128xf32>
    %149 = arith.addf %148, %147 : vector<16x128xf32>
    %150 = arith.divf %148, %149 : vector<16x128xf32>
    %151 = arith.addf %140, %143 : vector<16x128xf32>
    %152 = arith.mulf %150, %143 : vector<16x128xf32>
    %153 = arith.addf %142, %152 : vector<16x128xf32>
    %154 = vector.extract_strided_slice %116 {offsets = [48, 0], sizes = [16, 128], strides = [1, 1]} : vector<64x128xf32> to vector<16x128xf32>
    %155 = vector.extract_strided_slice %118 {offsets = [48, 0], sizes = [16, 128], strides = [1, 1]} : vector<64x128xf32> to vector<16x128xf32>
    %156 = arith.addf %9, %155 : vector<16x128xf32>
    %157 = arith.negf %156 : vector<16x128xf32>
    %158 = math.exp %157 : vector<16x128xf32>
    %cst_36 = arith.constant 1.000000e+00 : f32
    %159 = vector.broadcast %cst_36 : f32 to vector<16x128xf32>
    %160 = arith.addf %159, %158 : vector<16x128xf32>
    %161 = arith.divf %159, %160 : vector<16x128xf32>
    %162 = arith.addf %151, %154 : vector<16x128xf32>
    %163 = arith.mulf %161, %154 : vector<16x128xf32>
    %164 = arith.addf %153, %163 : vector<16x128xf32>
    %165 = arith.truncf %162 : vector<16x128xf32> to vector<16x128xbf16>
    %cst_37 = arith.constant dense<0.000000e+00> : vector<16x128xf32>
    %166 = tpu.matmul %165, %112, %cst_37 {dimension_numbers = #tpu.dot_dimension_numbers<[1], [0], [0], [1], [0, 0, 1, 1], [], []>} : vector<16x128xbf16>, vector<128x128xbf16>, vector<16x128xf32> -> vector<16x128xf32>
    %167 = arith.addf %13, %166 : vector<16x128xf32>
    %168 = arith.negf %167 : vector<16x128xf32>
    %169 = math.exp %168 : vector<16x128xf32>
    %cst_38 = arith.constant 1.000000e+00 : f32
    %170 = vector.broadcast %cst_38 : f32 to vector<16x128xf32>
    %171 = arith.addf %170, %169 : vector<16x128xf32>
    %172 = arith.divf %170, %171 : vector<16x128xf32>
    %173 = arith.truncf %164 : vector<16x128xf32> to vector<16x128xbf16>
    %cst_39 = arith.constant dense<0.000000e+00> : vector<16x128xf32>
    %174 = tpu.matmul %173, %113, %cst_39 {dimension_numbers = #tpu.dot_dimension_numbers<[1], [0], [0], [1], [0, 0, 1, 1], [], []>} : vector<16x128xbf16>, vector<128x128xbf16>, vector<16x128xf32> -> vector<16x128xf32>
    %175 = arith.addf %17, %174 : vector<16x128xf32>
    %176 = math.tanh %175 : vector<16x128xf32>
    %cst_40 = arith.constant 1.000000e+00 : f32
    %177 = vector.broadcast %cst_40 : f32 to vector<16x128xf32>
    %178 = arith.subf %177, %172 : vector<16x128xf32>
    %179 = arith.mulf %178, %162 : vector<16x128xf32>
    %180 = arith.mulf %172, %176 : vector<16x128xf32>
    %181 = arith.addf %179, %180 : vector<16x128xf32>
    %c1_i32 = arith.constant 1 : i32
    %182 = arith.truncf %181 : vector<16x128xf32> to vector<16x128xbf16>
    %cst_41 = arith.constant dense<0.000000e+00> : vector<64x128xf32>
    %183 = tpu.matmul %63, %182, %cst_41 {dimension_numbers = #tpu.dot_dimension_numbers<[1], [0], [0], [1], [0, 0, 1, 1], [], []>} : vector<64x16xbf16>, vector<16x128xbf16>, vector<64x128xf32> -> vector<64x128xf32>
    %184 = arith.truncf %183 : vector<64x128xf32> to vector<64x128xbf16>
    %cst_42 = arith.constant dense<0.000000e+00> : vector<64x128xf32>
    %185 = tpu.matmul %184, %111, %cst_42 {dimension_numbers = #tpu.dot_dimension_numbers<[1], [0], [0], [1], [0, 0, 1, 1], [], []>} : vector<64x128xbf16>, vector<128x128xbf16>, vector<64x128xf32> -> vector<64x128xf32>
    %cst_43 = arith.constant 0.000000e+00 : f32
    %186 = vector.broadcast %cst_43 : f32 to vector<16x128xf32>
    %cst_44 = arith.constant 0.000000e+00 : f32
    %187 = vector.broadcast %cst_44 : f32 to vector<16x128xf32>
    %188 = vector.extract_strided_slice %183 {offsets = [0, 0], sizes = [16, 128], strides = [1, 1]} : vector<64x128xf32> to vector<16x128xf32>
    %189 = vector.extract_strided_slice %185 {offsets = [0, 0], sizes = [16, 128], strides = [1, 1]} : vector<64x128xf32> to vector<16x128xf32>
    %190 = arith.addf %9, %189 : vector<16x128xf32>
    %191 = arith.negf %190 : vector<16x128xf32>
    %192 = math.exp %191 : vector<16x128xf32>
    %cst_45 = arith.constant 1.000000e+00 : f32
    %193 = vector.broadcast %cst_45 : f32 to vector<16x128xf32>
    %194 = arith.addf %193, %192 : vector<16x128xf32>
    %195 = arith.divf %193, %194 : vector<16x128xf32>
    %196 = arith.addf %186, %188 : vector<16x128xf32>
    %197 = arith.mulf %195, %188 : vector<16x128xf32>
    %198 = arith.addf %187, %197 : vector<16x128xf32>
    %199 = vector.extract_strided_slice %183 {offsets = [16, 0], sizes = [16, 128], strides = [1, 1]} : vector<64x128xf32> to vector<16x128xf32>
    %200 = vector.extract_strided_slice %185 {offsets = [16, 0], sizes = [16, 128], strides = [1, 1]} : vector<64x128xf32> to vector<16x128xf32>
    %201 = arith.addf %9, %200 : vector<16x128xf32>
    %202 = arith.negf %201 : vector<16x128xf32>
    %203 = math.exp %202 : vector<16x128xf32>
    %cst_46 = arith.constant 1.000000e+00 : f32
    %204 = vector.broadcast %cst_46 : f32 to vector<16x128xf32>
    %205 = arith.addf %204, %203 : vector<16x128xf32>
    %206 = arith.divf %204, %205 : vector<16x128xf32>
    %207 = arith.addf %196, %199 : vector<16x128xf32>
    %208 = arith.mulf %206, %199 : vector<16x128xf32>
    %209 = arith.addf %198, %208 : vector<16x128xf32>
    %210 = vector.extract_strided_slice %183 {offsets = [32, 0], sizes = [16, 128], strides = [1, 1]} : vector<64x128xf32> to vector<16x128xf32>
    %211 = vector.extract_strided_slice %185 {offsets = [32, 0], sizes = [16, 128], strides = [1, 1]} : vector<64x128xf32> to vector<16x128xf32>
    %212 = arith.addf %9, %211 : vector<16x128xf32>
    %213 = arith.negf %212 : vector<16x128xf32>
    %214 = math.exp %213 : vector<16x128xf32>
    %cst_47 = arith.constant 1.000000e+00 : f32
    %215 = vector.broadcast %cst_47 : f32 to vector<16x128xf32>
    %216 = arith.addf %215, %214 : vector<16x128xf32>
    %217 = arith.divf %215, %216 : vector<16x128xf32>
    %218 = arith.addf %207, %210 : vector<16x128xf32>
    %219 = arith.mulf %217, %210 : vector<16x128xf32>
    %220 = arith.addf %209, %219 : vector<16x128xf32>
    %221 = vector.extract_strided_slice %183 {offsets = [48, 0], sizes = [16, 128], strides = [1, 1]} : vector<64x128xf32> to vector<16x128xf32>
    %222 = vector.extract_strided_slice %185 {offsets = [48, 0], sizes = [16, 128], strides = [1, 1]} : vector<64x128xf32> to vector<16x128xf32>
    %223 = arith.addf %9, %222 : vector<16x128xf32>
    %224 = arith.negf %223 : vector<16x128xf32>
    %225 = math.exp %224 : vector<16x128xf32>
    %cst_48 = arith.constant 1.000000e+00 : f32
    %226 = vector.broadcast %cst_48 : f32 to vector<16x128xf32>
    %227 = arith.addf %226, %225 : vector<16x128xf32>
    %228 = arith.divf %226, %227 : vector<16x128xf32>
    %229 = arith.addf %218, %221 : vector<16x128xf32>
    %230 = arith.mulf %228, %221 : vector<16x128xf32>
    %231 = arith.addf %220, %230 : vector<16x128xf32>
    %232 = arith.truncf %229 : vector<16x128xf32> to vector<16x128xbf16>
    %cst_49 = arith.constant dense<0.000000e+00> : vector<16x128xf32>
    %233 = tpu.matmul %232, %112, %cst_49 {dimension_numbers = #tpu.dot_dimension_numbers<[1], [0], [0], [1], [0, 0, 1, 1], [], []>} : vector<16x128xbf16>, vector<128x128xbf16>, vector<16x128xf32> -> vector<16x128xf32>
    %234 = arith.addf %13, %233 : vector<16x128xf32>
    %235 = arith.negf %234 : vector<16x128xf32>
    %236 = math.exp %235 : vector<16x128xf32>
    %cst_50 = arith.constant 1.000000e+00 : f32
    %237 = vector.broadcast %cst_50 : f32 to vector<16x128xf32>
    %238 = arith.addf %237, %236 : vector<16x128xf32>
    %239 = arith.divf %237, %238 : vector<16x128xf32>
    %240 = arith.truncf %231 : vector<16x128xf32> to vector<16x128xbf16>
    %cst_51 = arith.constant dense<0.000000e+00> : vector<16x128xf32>
    %241 = tpu.matmul %240, %113, %cst_51 {dimension_numbers = #tpu.dot_dimension_numbers<[1], [0], [0], [1], [0, 0, 1, 1], [], []>} : vector<16x128xbf16>, vector<128x128xbf16>, vector<16x128xf32> -> vector<16x128xf32>
    %242 = arith.addf %17, %241 : vector<16x128xf32>
    %243 = math.tanh %242 : vector<16x128xf32>
    %cst_52 = arith.constant 1.000000e+00 : f32
    %244 = vector.broadcast %cst_52 : f32 to vector<16x128xf32>
    %245 = arith.subf %244, %239 : vector<16x128xf32>
    %246 = arith.mulf %245, %229 : vector<16x128xf32>
    %247 = arith.mulf %239, %243 : vector<16x128xf32>
    %248 = arith.addf %246, %247 : vector<16x128xf32>
    %c2_i32 = arith.constant 2 : i32
    %249 = arith.truncf %248 : vector<16x128xf32> to vector<16x128xbf16>
    %cst_53 = arith.constant dense<0.000000e+00> : vector<64x128xf32>
    %250 = tpu.matmul %63, %249, %cst_53 {dimension_numbers = #tpu.dot_dimension_numbers<[1], [0], [0], [1], [0, 0, 1, 1], [], []>} : vector<64x16xbf16>, vector<16x128xbf16>, vector<64x128xf32> -> vector<64x128xf32>
    %251 = arith.truncf %250 : vector<64x128xf32> to vector<64x128xbf16>
    %cst_54 = arith.constant dense<0.000000e+00> : vector<64x128xf32>
    %252 = tpu.matmul %251, %111, %cst_54 {dimension_numbers = #tpu.dot_dimension_numbers<[1], [0], [0], [1], [0, 0, 1, 1], [], []>} : vector<64x128xbf16>, vector<128x128xbf16>, vector<64x128xf32> -> vector<64x128xf32>
    %cst_55 = arith.constant 0.000000e+00 : f32
    %253 = vector.broadcast %cst_55 : f32 to vector<16x128xf32>
    %cst_56 = arith.constant 0.000000e+00 : f32
    %254 = vector.broadcast %cst_56 : f32 to vector<16x128xf32>
    %255 = vector.extract_strided_slice %250 {offsets = [0, 0], sizes = [16, 128], strides = [1, 1]} : vector<64x128xf32> to vector<16x128xf32>
    %256 = vector.extract_strided_slice %252 {offsets = [0, 0], sizes = [16, 128], strides = [1, 1]} : vector<64x128xf32> to vector<16x128xf32>
    %257 = arith.addf %9, %256 : vector<16x128xf32>
    %258 = arith.negf %257 : vector<16x128xf32>
    %259 = math.exp %258 : vector<16x128xf32>
    %cst_57 = arith.constant 1.000000e+00 : f32
    %260 = vector.broadcast %cst_57 : f32 to vector<16x128xf32>
    %261 = arith.addf %260, %259 : vector<16x128xf32>
    %262 = arith.divf %260, %261 : vector<16x128xf32>
    %263 = arith.addf %253, %255 : vector<16x128xf32>
    %264 = arith.mulf %262, %255 : vector<16x128xf32>
    %265 = arith.addf %254, %264 : vector<16x128xf32>
    %266 = vector.extract_strided_slice %250 {offsets = [16, 0], sizes = [16, 128], strides = [1, 1]} : vector<64x128xf32> to vector<16x128xf32>
    %267 = vector.extract_strided_slice %252 {offsets = [16, 0], sizes = [16, 128], strides = [1, 1]} : vector<64x128xf32> to vector<16x128xf32>
    %268 = arith.addf %9, %267 : vector<16x128xf32>
    %269 = arith.negf %268 : vector<16x128xf32>
    %270 = math.exp %269 : vector<16x128xf32>
    %cst_58 = arith.constant 1.000000e+00 : f32
    %271 = vector.broadcast %cst_58 : f32 to vector<16x128xf32>
    %272 = arith.addf %271, %270 : vector<16x128xf32>
    %273 = arith.divf %271, %272 : vector<16x128xf32>
    %274 = arith.addf %263, %266 : vector<16x128xf32>
    %275 = arith.mulf %273, %266 : vector<16x128xf32>
    %276 = arith.addf %265, %275 : vector<16x128xf32>
    %277 = vector.extract_strided_slice %250 {offsets = [32, 0], sizes = [16, 128], strides = [1, 1]} : vector<64x128xf32> to vector<16x128xf32>
    %278 = vector.extract_strided_slice %252 {offsets = [32, 0], sizes = [16, 128], strides = [1, 1]} : vector<64x128xf32> to vector<16x128xf32>
    %279 = arith.addf %9, %278 : vector<16x128xf32>
    %280 = arith.negf %279 : vector<16x128xf32>
    %281 = math.exp %280 : vector<16x128xf32>
    %cst_59 = arith.constant 1.000000e+00 : f32
    %282 = vector.broadcast %cst_59 : f32 to vector<16x128xf32>
    %283 = arith.addf %282, %281 : vector<16x128xf32>
    %284 = arith.divf %282, %283 : vector<16x128xf32>
    %285 = arith.addf %274, %277 : vector<16x128xf32>
    %286 = arith.mulf %284, %277 : vector<16x128xf32>
    %287 = arith.addf %276, %286 : vector<16x128xf32>
    %288 = vector.extract_strided_slice %250 {offsets = [48, 0], sizes = [16, 128], strides = [1, 1]} : vector<64x128xf32> to vector<16x128xf32>
    %289 = vector.extract_strided_slice %252 {offsets = [48, 0], sizes = [16, 128], strides = [1, 1]} : vector<64x128xf32> to vector<16x128xf32>
    %290 = arith.addf %9, %289 : vector<16x128xf32>
    %291 = arith.negf %290 : vector<16x128xf32>
    %292 = math.exp %291 : vector<16x128xf32>
    %cst_60 = arith.constant 1.000000e+00 : f32
    %293 = vector.broadcast %cst_60 : f32 to vector<16x128xf32>
    %294 = arith.addf %293, %292 : vector<16x128xf32>
    %295 = arith.divf %293, %294 : vector<16x128xf32>
    %296 = arith.addf %285, %288 : vector<16x128xf32>
    %297 = arith.mulf %295, %288 : vector<16x128xf32>
    %298 = arith.addf %287, %297 : vector<16x128xf32>
    %299 = arith.truncf %296 : vector<16x128xf32> to vector<16x128xbf16>
    %cst_61 = arith.constant dense<0.000000e+00> : vector<16x128xf32>
    %300 = tpu.matmul %299, %112, %cst_61 {dimension_numbers = #tpu.dot_dimension_numbers<[1], [0], [0], [1], [0, 0, 1, 1], [], []>} : vector<16x128xbf16>, vector<128x128xbf16>, vector<16x128xf32> -> vector<16x128xf32>
    %301 = arith.addf %13, %300 : vector<16x128xf32>
    %302 = arith.negf %301 : vector<16x128xf32>
    %303 = math.exp %302 : vector<16x128xf32>
    %cst_62 = arith.constant 1.000000e+00 : f32
    %304 = vector.broadcast %cst_62 : f32 to vector<16x128xf32>
    %305 = arith.addf %304, %303 : vector<16x128xf32>
    %306 = arith.divf %304, %305 : vector<16x128xf32>
    %307 = arith.truncf %298 : vector<16x128xf32> to vector<16x128xbf16>
    %cst_63 = arith.constant dense<0.000000e+00> : vector<16x128xf32>
    %308 = tpu.matmul %307, %113, %cst_63 {dimension_numbers = #tpu.dot_dimension_numbers<[1], [0], [0], [1], [0, 0, 1, 1], [], []>} : vector<16x128xbf16>, vector<128x128xbf16>, vector<16x128xf32> -> vector<16x128xf32>
    %309 = arith.addf %17, %308 : vector<16x128xf32>
    %310 = math.tanh %309 : vector<16x128xf32>
    %cst_64 = arith.constant 1.000000e+00 : f32
    %311 = vector.broadcast %cst_64 : f32 to vector<16x128xf32>
    %312 = arith.subf %311, %306 : vector<16x128xf32>
    %313 = arith.mulf %312, %296 : vector<16x128xf32>
    %314 = arith.mulf %306, %310 : vector<16x128xf32>
    %315 = arith.addf %313, %314 : vector<16x128xf32>
    %316 = tpu.iota {dimensions = array<i32: 0>} : vector<16x128xi32>
    %c0_i32_65 = arith.constant 0 : i32
    %317 = vector.broadcast %c0_i32_65 : i32 to vector<16x128xi32>
    %318 = arith.cmpi ne, %316, %317 : vector<16x128xi32>
    %319 = arith.extui %318 : vector<16x128xi1> to vector<16x128xi32>
    %320 = arith.sitofp %319 : vector<16x128xi32> to vector<16x128xf32>
    %321 = arith.mulf %315, %320 : vector<16x128xf32>
    %322 = arith.truncf %321 : vector<16x128xf32> to vector<16x128xbf16>
    %cst_66 = arith.constant dense<0.000000e+00> : vector<16x128xf32>
    %323 = tpu.matmul %110, %322, %cst_66 {dimension_numbers = #tpu.dot_dimension_numbers<[1], [0], [0], [1], [0, 0, 1, 1], [], []>} : vector<16x16xbf16>, vector<16x128xbf16>, vector<16x128xf32> -> vector<16x128xf32>
    %c0_67 = arith.constant 0 : index
    %c0_68 = arith.constant 0 : index
    %324 = vector.load %arg0[%c0_67, %c0_68] : memref<16x8xf32, #tpu.memory_space<vmem>>, vector<16x8xf32>
    %325 = arith.truncf %324 : vector<16x8xf32> to vector<16x8xbf16>
    %c0_69 = arith.constant 0 : index
    %c0_70 = arith.constant 0 : index
    %326 = vector.load %arg11[%c0_69, %c0_70] : memref<8x128xbf16, #tpu.memory_space<vmem>>, vector<8x128xbf16>
    %cst_71 = arith.constant dense<0.000000e+00> : vector<16x128xf32>
    %327 = tpu.matmul %325, %326, %cst_71 {dimension_numbers = #tpu.dot_dimension_numbers<[1], [0], [0], [1], [0, 0, 1, 1], [], []>} : vector<16x8xbf16>, vector<8x128xbf16>, vector<16x128xf32> -> vector<16x128xf32>
    %328 = arith.truncf %323 : vector<16x128xf32> to vector<16x128xbf16>
    %c0_72 = arith.constant 0 : index
    %c0_73 = arith.constant 0 : index
    %329 = vector.load %arg12[%c0_72, %c0_73] : memref<128x128xbf16, #tpu.memory_space<vmem>>, vector<128x128xbf16>
    %cst_74 = arith.constant dense<0.000000e+00> : vector<16x128xf32>
    %330 = tpu.matmul %328, %329, %cst_74 {dimension_numbers = #tpu.dot_dimension_numbers<[1], [0], [0], [1], [0, 0, 1, 1], [], []>} : vector<16x128xbf16>, vector<128x128xbf16>, vector<16x128xf32> -> vector<16x128xf32>
    %331 = arith.addf %327, %330 : vector<16x128xf32>
    %c0_75 = arith.constant 0 : index
    %c0_76 = arith.constant 0 : index
    %332 = vector.load %arg13[%c0_75, %c0_76] : memref<1x128xf32, #tpu.memory_space<vmem>>, vector<1x128xf32>
    %333 = vector.broadcast %332 : vector<1x128xf32> to vector<16x128xf32>
    %334 = arith.addf %331, %333 : vector<16x128xf32>
    %335 = tpu.iota {dimensions = array<i32: 0>} : vector<16x128xi32>
    %c0_i32_77 = arith.constant 0 : i32
    %336 = vector.broadcast %c0_i32_77 : i32 to vector<16x128xi32>
    %337 = arith.cmpi ne, %335, %336 : vector<16x128xi32>
    %338 = arith.extui %337 : vector<16x128xi1> to vector<16x128xi32>
    %339 = arith.sitofp %338 : vector<16x128xi32> to vector<16x128xf32>
    %cst_78 = arith.constant 0.000000e+00 : f32
    %340 = vector.broadcast %cst_78 : f32 to vector<16x128xf32>
    %341 = arith.maximumf %334, %340 : vector<16x128xf32>
    %342 = arith.mulf %341, %339 : vector<16x128xf32>
    %c0_79 = arith.constant 0 : index
    %c0_80 = arith.constant 0 : index
    %343 = vector.load %arg14[%c0_79, %c0_80] : memref<16x128xf32, #tpu.memory_space<vmem>>, vector<16x128xf32>
    tpu.vector_store %arg14[%c0_79, %c0_80], %342 {strides = array<i32>} : memref<16x128xf32, #tpu.memory_space<vmem>>, vector<16x128xf32>,
    %c0_81 = arith.constant 0 : index
    %c0_82 = arith.constant 0 : index
    %344 = vector.load %arg15[%c0_81, %c0_82] : memref<16x128xf32, #tpu.memory_space<vmem>>, vector<16x128xf32>
    tpu.vector_store %arg15[%c0_81, %c0_82], %321 {strides = array<i32>} : memref<16x128xf32, #tpu.memory_space<vmem>>, vector<16x128xf32>,
    return
  }
}

</mosaic_0001>

<bundles_post_ra>
// kernel: mpn_layer_forward.1
= control target key start
LH: loop header
LB: loop body
LE: loop exit
PB: predicated region body
PF: predicated region fallthrough
CT: control target
= control target key end

     0   :  { %21 = vsyncpa [#allocation3], 0  ;;  %s3483_s0 = inlined_call_operand.vmem [shape: f32[16,8], index: 0, kind: input, shape index: {}]   ;;  %s3484_s1 = inlined_call_operand.vmem [shape: f32[16,16], index: 1, kind: input, shape index: {}]   ;;  %s3485_s2 = inlined_call_operand.vmem [shape: s32[16,4], index: 2, kind: input, shape index: {}]   ;;  %s3486_s3 = inlined_call_operand.vmem [shape: s32[16,4], index: 3, kind: input, shape index: {}]   ;;  %s3487_s4 = inlined_call_operand.hbm [shape: bf16[16,384], index: 4, kind: input, shape index: {}]   ;;  %s3488_s5 = inlined_call_operand.vmem [shape: bf16[128,128], index: 5, kind: input, shape index: {}]   ;;  %s3489_s6 = inlined_call_operand.vmem [shape: f32[1,128], index: 6, kind: input, shape index: {}]   ;;  %s3490_s7 = inlined_call_operand.hbm [shape: bf16[128,128], index: 7, kind: input, shape index: {}]   ;;  %s3491_s8 = inlined_call_operand.vmem [shape: f32[1,128], index: 8, kind: input, shape index: {}]   ;;  %s3492_s9 = inlined_call_operand.hbm [shape: bf16[128,128], index: 9, kind: input, shape index: {}]   ;;  %s3493_s10 = inlined_call_operand.vmem [shape: f32[1,128], index: 10, kind: input, shape index: {}]   ;;  %s3494_s11 = inlined_call_operand.vmem [shape: bf16[8,128], index: 11, kind: input, shape index: {}]   ;;  %s3495_s12 = inlined_call_operand.hbm [shape: bf16[128,128], index: 12, kind: input, shape index: {}]   ;;  %s3496_s13 = inlined_call_operand.hbm [shape: f32[1,128], index: 13, kind: input, shape index: {}]   ;;  %s3497_s14 = inlined_call_operand.hbm [shape: f32[16,128], index: 14, kind: output, shape index: {0}]   ;;  %s3498_s15 = inlined_call_operand.hbm [shape: f32[16,128], index: 15, kind: output, shape index: {1}]  }
   0x1   :  { %22 = vsyncpa [#allocation6], 0 }
   0x2   :  { %23 = vsyncpa [#allocation9], 0 }
   0x3   :  { %24 = vsyncpa [#allocation4], 0 }
   0x4   :  { %25 = vsyncpa [#allocation13], 0  ;;  %s2742_s18 = smov [#allocation5]  }
   0x5   :  { %s55_s19 = sshll.u32 %s2742_s18, 4  ;;  %s56_s19 = int_to_ptr.vmem [resolvable:$true] %s55_s19 }
   0x6   :  { %s2600_s20 = scalar_lea.vmem %s56_s19, 1024  ;;  %p2605_p1 = scmp.lt.s32.totalorder %s56_s19, %s56_s19 }
   0x7   :  { %p2601_p0 = scmp.ne.s32.totalorder %s56_s19, %s2600_s20  ;;  %p2606_p2 = scmp.lt.s32.totalorder %s2600_s20, %s2600_s20 }
   0x9   :  { %p2607_p3 = por %p2606_p2, %p2605_p1 }
   0xb   :  { %p2608_p4 = pnand %p2607_p3, %p2601_p0 }
   0xd   :  { %2611 = shalt.err (!%p2608_p4)
}
   0xe   :  { %s2743_s21 = smov 64   ;;  %s2744_s22 = smov 4  }
   0xf   :  { %61 = dma.hbm_to_vmem [thread:$0]  %s3490_s7, 1024, %s56_s19, [#allocation6], %s2743_s21, %s2743_s21, %s2744_s22  }
  0x10   :  { %s2745_s25 = smov [#allocation8]   ;;  %s2746_s27 = smov [#allocation2]  }
  0x11   :  { %s85_s26 = sshll.u32 %s2745_s25, 4  ;;  %s39_s28 = sshll.u32 %s2746_s27, 4  ;;  %s86_s26 = int_to_ptr.vmem [resolvable:$true] %s85_s26  ;;  %s40_s28 = int_to_ptr.vmem [resolvable:$true] %s39_s28 }
  0x12   :  { %s2620_s29 = scalar_lea.vmem %s86_s26, 1024  ;;  %p2625_p6 = scmp.lt.s32.totalorder %s86_s26, %s86_s26 }
  0x13   :  { %p2621_p5 = scmp.ne.s32.totalorder %s86_s26, %s2620_s29  ;;  %p2626_p7 = scmp.lt.s32.totalorder %s2620_s29, %s2620_s29 }
  0x15   :  { %p2627_p8 = por %p2626_p7, %p2625_p6 }
  0x17   :  { %p2628_p9 = pnand %p2627_p8, %p2621_p5 }
  0x19   :  { %2631 = shalt.err (!%p2628_p9)
}
  0x1a   :  { %91 = dma.hbm_to_vmem [thread:$0]  %s3495_s12, 1024, %s86_s26, [#allocation9], %s2743_s21, %s2743_s21, %s2744_s22  }
  0x1b   :  { %s2640_s7 = scalar_lea.vmem %s40_s28, 384  ;;  %p2645_p11 = scmp.lt.s32.totalorder %s40_s28, %s40_s28 }
  0x1c   :  { %p2641_p10 = scmp.ne.s32.totalorder %s40_s28, %s2640_s7  ;;  %p2646_p12 = scmp.lt.s32.totalorder %s2640_s7, %s2640_s7 }
  0x1e   :  { %p2647_p13 = por %p2646_p12, %p2645_p11 }
  0x20   :  { %p2648_p0 = pnand %p2647_p13, %p2641_p10 }
  0x22   :  { %2651 = shalt.err (!%p2648_p0)
}
  0x23   :  { %s2747_s17 = smov 192   ;;  %s2748_s18 = smov 12  }
  0x24   :  { %45 = dma.hbm_to_vmem [thread:$0]  %s3487_s4, 384, %s40_s28, [#allocation3], %s2747_s17, %s2747_s17, %s2748_s18  }
  0x25   :  { %s2749_s23 = smov [#allocation7]   ;;  %s2750_s25 = smov [#allocation10]  }
  0x26   :  { %s69_s24 = sshll.u32 %s2749_s23, 4  ;;  %s98_s27 = sshll.u32 %s2750_s25, 4  ;;  %s70_s24 = int_to_ptr.vmem [resolvable:$true] %s69_s24  ;;  %s99_s27 = int_to_ptr.vmem [resolvable:$true] %s98_s27 }
  0x27   :  { %s2660_s12 = scalar_lea.vmem %s70_s24, 1024  ;;  %p2665_p2 = scmp.lt.s32.totalorder %s70_s24, %s70_s24 }
  0x28   :  { %p2661_p1 = scmp.ne.s32.totalorder %s70_s24, %s2660_s12  ;;  %p2666_p3 = scmp.lt.s32.totalorder %s2660_s12, %s2660_s12 }
  0x2a   :  { %p2667_p4 = por %p2666_p3, %p2665_p2 }
  0x2c   :  { %p2668_p5 = pnand %p2667_p4, %p2661_p1 }
  0x2e   :  { %2671 = shalt.err (!%p2668_p5)
}
  0x2f   :  { %75 = dma.hbm_to_vmem [thread:$0]  %s3492_s9, 1024, %s70_s24, [#allocation6], %s2743_s21, %s2743_s21, %s2744_s22  }
  0x30   :  { %s2680_s4 = scalar_lea.vmem %s99_s27, 16  ;;  %s2684_s28 = scalar_lea.vmem %s99_s27, 32 }
  0x31   :  { %p2681_p6 = scmp.ne.s32.totalorder %s99_s27, %s2680_s4  ;;  %p2685_p7 = scmp.lt.s32.totalorder %s99_s27, %s99_s27 }
  0x32   :  { %p2686_p8 = scmp.lt.s32.totalorder %s2684_s28, %s2680_s4 }
  0x34   :  { %p2687_p9 = por %p2686_p8, %p2685_p7 }
  0x36   :  { %p2688_p10 = pnand %p2687_p9, %p2681_p6 }
  0x38   :  { %2691 = shalt.err (!%p2688_p10)
}
  0x39   :  { %101 = dma.hbm_to_vmem [thread:$0]  %s3496_s13, 16, %s99_s27, [#allocation9]  }
  0x3a   :  { %2732 = dma.done.wait [#allocation3], 384  }
  0x3b   :  { %2733 = vsyncadd [#allocation3], 4294966912 }
  0x3c   :  { %2734 = dma.done.wait [#allocation6], 2048  }
  0x3d   :  { %2735 = vsyncadd [#allocation6], 4294965248 }
  0x3e   :  { %2736 = dma.done.wait [#allocation9], 1040  }
  0x3f   :  { %2737 = vsyncadd [#allocation9], 4294966256  ;;  %v3504_v0 = vmov 1   ;;  %v3506_v1 = vmov 0   ;;  %v119_v2 = vld [vmem:[%s3486_s3 + $0x8] sm:$0xff]  ;;  %v118_v3 = vld [vmem:[%s3486_s3] sm:$0xff]  ;;  %v3499_v21 = vlaneseq }
  0x40   :  { %2407 = vset.pattern.permute.xlu1 %v3504_v0  ;;  %2405 = vset.pattern.permute.xlu0 %v3506_v1  ;;  %vm270_vm0 = vcmp.ne.s32.totalorder %v118_v3, 0  ;;  %vm271_vm1 = vcmp.ne.s32.totalorder %v119_v2, 0  ;;  %v2422_v5 = vld [vmem:[#allocation2 + $0x4] ss:$12 sps:$4 sm:$0xff]   ;;  %v3508_v6 = vmov 0.0   ;;  %v123_v9 = vld [vmem:[%s3484_s1 + $0x8] sm:$0xff] }
  0x41   :  { %181 = vmatprep.mubr.bf16.mxu0 %v3506_v1  ;;  %293 = vperm.xlu1 %2407, %v119_v2   ;;  %v272_v4 = vsel %vm270_vm0, 1, %v3506_v1  ;;  %v2424_v7 = vld [vmem:[#allocation2] ss:$12 sps:$4 sm:$0xff]   ;;  %v273_v11 = vsel %vm271_vm1, 1, %v3506_v1  ;;  %vm3513_vm2 = vcmask 130048   ;;  %v3502_v12 = vmov 2  }
  0x42   :  { %263 = vperm.xlu0 %2405, %v118_v3   ;;  %2126 = vmatprep.subr.bf16.mxu1 %v3508_v6  ;;  %v122_v8 = vld [vmem:[%s3484_s1] sm:$0xff]  ;;  %v3500_v13 = vmov 3   ;;  %v2425_v14 = vld [vmem:[#allocation2 + $0x8] ss:$12 sps:$4 sm:$0xff]   ;;  %vm3512_vm3 = vmmov 0   ;;  %v2910_v18 = vld [vmem:[#allocation5 + $0x20] sm:$0xff]  }
  0x43   :  { %163 = vmatprep.subr.bf16.mxu0 %v2422_v5  ;;  %v124_v10 = vpack.c.bf16 %v123_v9, %v122_v8  ;;  %v2895_v15 = vld [vmem:[#allocation5 + $0x38] sm:$0xff]   ;;  %2128 = vmatprep.mubr.msk.bf16.mxu1 %vm3512_vm3, %v3508_v6  ;;  %v2900_v16 = vld [vmem:[#allocation5 + $0x30] sm:$0xff]   ;;  %v2906_v17 = vld [vmem:[#allocation5 + $0x28] sm:$0xff]   ;;  %v2924_v24 = vand.u32 127, %v3499_v21 }
  0x44   :  { %164 = vmatpush1.bf16.msra.mxu0 %v2424_v7  ;;  %2127 = vmatpush3.bf16.msra.mxu1 %v2425_v14  ;;  %v2915_v19 = vld [vmem:[#allocation5 + $0x18] sm:$0xff]   ;;  %v2919_v20 = vld [vmem:[#allocation5 + $0x10] sm:$0xff]   ;;  %v2960_v51 = vld [vmem:[#allocation5 + $0x8] sm:$0xff]  }
  0x45   :  { %2408 = vset.pattern.permute.xlu1 %v3506_v1  ;;  %2132 = vmatprep.subr.bf16.mxu0 %v3506_v1  ;;  %3514 = vst [vmem:[#allocation19_spill] sm:$0xff] %v2924_v24  ;;  %v2966_v52 = vld [vmem:[%s3488_s5 + $0x38] sm:$0xff]   ;;  %v2977_v54 = vld [vmem:[%s3488_s5 + $0x30] sm:$0xff]   ;;  %v2986_v55 = vld [vmem:[%s3488_s5 + $0x28] sm:$0xff]  }
  0x46   :  { %266 = vperm.xlu0 %2405, %v119_v2   ;;  %275 = vperm.xlu1 %2408, %v272_v4   ;;  %v2970_v53 = vld [vmem:[#allocation5] sm:$0xff]   ;;  %v2992_v56 = vld [vmem:[%s3488_s5 + $0x20] sm:$0xff]   ;;  %v3007_v58 = vld [vmem:[%s3488_s5 + $0x10] sm:$0xff]  }
  0x47   :  { %1907 = vmatmul.mubr.msk.bf16.vlgmr.msra.gmra.mxu0 %vm3513_vm2, %v124_v10  ;;  %2142 = vmatprep.subr.bf16.mxu1 %v2895_v15  ;;  %v2999_v57 = vld [vmem:[%s3488_s5 + $0x18] sm:$0xff]   ;;  %v3014_v59 = vld [vmem:[%s3488_s5 + $0x8] sm:$0xff]   ;;  %v3021_v60 = vld [vmem:[%s3488_s5] sm:$0xff]  }
  0x48   :  { %2133 = vmatpush3.bf16.msra.mxu0 %v3506_v1  ;;  %2129 = vmatmul.mubr.msk.bf16.vlgmr.msra.gmra.mxu1 %vm3513_vm2, %v124_v10 }
  0x49   :  { %2166 = vmatprep.subr.bf16.mxu0 %v3508_v6  ;;  %2143 = vmatpush3.bf16.msra.mxu1 %v2895_v15 }
  0x4a   :  { %2406 = vset.pattern.permute.xlu0 %v3504_v0  ;;  %278 = vperm.xlu1 %2408, %v273_v11  }
  0x4b   :  { %290 = vperm.xlu0 %2406, %v118_v3   ;;  %2144 = vmatprep.subr.bf16.mxu1 %v2900_v16 }
  0x4d   :  { %2145 = vmatpush3.bf16.msra.mxu1 %v2900_v16 }
  0x4e   :  { %2409 = vset.pattern.permute.xlu1 %v3504_v0  ;;  %2146 = vmatprep.subr.bf16.mxu1 %v2906_v17 }
  0x4f   :  { %301 = vperm.xlu0 %2406, %v273_v11   ;;  %298 = vperm.xlu1 %2409, %v272_v4  }
  0x51   :  { %2147 = vmatpush3.bf16.msra.mxu1 %v2906_v17 }
  0x52   :  { %2148 = vmatprep.subr.bf16.mxu1 %v2910_v18 }
  0x53   :  { %2411 = vset.pattern.permute.xlu0 %v3502_v12  ;;  %2410 = vset.pattern.permute.xlu1 %v3502_v12 }
  0x54   :  { %316 = vperm.xlu0 %2411, %v119_v2   ;;  %313 = vperm.xlu1 %2410, %v118_v3  }
  0x55   :  { %2149 = vmatpush3.bf16.msra.mxu1 %v2910_v18 }
  0x56   :  { %2150 = vmatprep.subr.bf16.mxu1 %v2915_v19 }
  0x58   :  { %2412 = vset.pattern.permute.xlu0 %v3500_v13  ;;  %321 = vperm.xlu1 %2410, %v272_v4  }
  0x59   :  { %336 = vperm.xlu0 %2412, %v118_v3   ;;  %2151 = vmatpush3.bf16.msra.mxu1 %v2915_v19 }
  0x5a   :  { %2152 = vmatprep.subr.bf16.mxu1 %v2919_v20 }
  0x5c   :  { %324 = vperm.xlu1 %2410, %v273_v11  }
  0x5d   :  { %347 = vperm.xlu0 %2412, %v273_v11   ;;  %2153 = vmatpush3.bf16.msra.mxu1 %v2919_v20 }
  0x5e   :  { %2154 = vmatprep.subr.bf16.mxu1 %v2960_v51 }
  0x60   :  { %2413 = vset.pattern.permute.xlu1 %v3500_v13 }
  0x61   :  { %2415 = vset.pattern.permute.xlu0 %v3506_v1  ;;  %339 = vperm.xlu1 %2413, %v119_v2  }
  0x62   :  { %2155 = vmatpush3.bf16.msra.mxu1 %v2960_v51 }
  0x63   :  { %2156 = vmatprep.subr.bf16.mxu1 %v2970_v53 }
  0x65   :  { %344 = vperm.xlu1 %2413, %v272_v4  }
  0x66   :  { %2157 = vmatpush3.bf16.msra.mxu1 %v2970_v53 }
  0x67   :  { %2186 = vmatprep.subr.bf16.mxu1 %v3508_v6 }
  0x69   :  { %2414 = vset.pattern.permute.xlu1 %v3506_v1 }
  0xbc   :  { %v294_v22 = vpop.permute.xlu1 %293 }
  0xbd   :  { %v264_v23 = vpop.permute.xlu0 %263  ;;  %vm296_vm11 = vcmp.eq.s32.totalorder %v2924_v24, %v294_v22 }
  0xbe   :  { %vm268_vm4 = vcmp.eq.s32.totalorder %v2924_v24, %v264_v23 }
  0xc1   :  { %v267_v25 = vpop.permute.xlu0 %266  ;;  %v276_v26 = vpop.permute.xlu1 %275 }
  0xc2   :  { %vm280_vm5 = vcmp.eq.s32.totalorder %v276_v26, 1  ;;  %vm269_vm6 = vcmp.eq.s32.totalorder %v2924_v24, %v267_v25 }
  0xc3   :  { %vm282_vm7 = vmand %vm268_vm4, %vm280_vm5 }
  0xc4   :  { %v1912_v29 = vsel %vm282_vm7, 1.0, %v3508_v6 }
  0xc5   :  { %v279_v28 = vpop.permute.xlu1 %278 }
  0xc6   :  { %v291_v27 = vpop.permute.xlu0 %290  ;;  %vm281_vm8 = vcmp.eq.s32.totalorder %v279_v28, 1 }
  0xc7   :  { %vm283_vm9 = vmand %vm269_vm6, %vm281_vm8  ;;  %vm295_vm10 = vcmp.eq.s32.totalorder %v2924_v24, %v291_v27 }
  0xc8   :  { %v1913_v30 = vsel %vm283_vm9, 1.0, %v3508_v6 }
  0xc9   :  { %v2931_v31 = vpack.c.bf16 %v1913_v30, %v1912_v29 }
  0xca   :  { %v302_v32 = vpop.permute.xlu0 %301  ;;  %v299_v33 = vpop.permute.xlu1 %298 }
  0xcb   :  { %vm304_vm12 = vcmp.eq.s32.totalorder %v302_v32, 1  ;;  %vm303_vm14 = vcmp.eq.s32.totalorder %v299_v33, 1  ;;  %2134 = vmatprep.mubr.msk.bf16.mxu0 %vm3513_vm2, %v2931_v31 }
  0xcc   :  { %vm306_vm13 = vmand %vm296_vm11, %vm304_vm12 }
  0xcd   :  { %v1915_v34 = vsel %vm306_vm13, 1.0, %v3508_v6  ;;  %vm305_vm15 = vmand %vm295_vm10, %vm303_vm14 }
  0xce   :  { %v1914_v35 = vsel %vm305_vm15, 1.0, %v3508_v6 }
  0xcf   :  { %v2938_v36 = vpack.c.bf16 %v1915_v34, %v1914_v35  ;;  %v317_v37 = vpop.permute.xlu0 %316  ;;  %v314_v38 = vpop.permute.xlu1 %313 }
  0xd0   :  { %vm318_vm1 = vcmp.eq.s32.totalorder %v2924_v24, %v314_v38  ;;  %vm319_vm4 = vcmp.eq.s32.totalorder %v2924_v24, %v317_v37 }
  0xd1   :  { %2135 = vmatmul.mubr.msk.bf16.vlgmr.msra.gmra.mxu0 %vm3513_vm2, %v2938_v36 }
  0xd2   :  { %2167 = vmatpush3.bf16.msra.mxu0 %v2966_v52 }
  0xd3   :  { %v322_v39 = vpop.permute.xlu1 %321  ;;  %2168 = vmatprep.subr.bf16.mxu0 %v3508_v6 }
  0xd4   :  { %vm326_vm0 = vcmp.eq.s32.totalorder %v322_v39, 1  ;;  %v337_v40 = vpop.permute.xlu0 %336  ;;  %v3074_v39 = vld [vmem:[#allocation7 + $0x38] sm:$0xff]  }
  0xd5   :  { %vm328_vm5 = vmand %vm318_vm1, %vm326_vm0  ;;  %vm341_vm11 = vcmp.eq.s32.totalorder %v2924_v24, %v337_v40  ;;  %v3078_v40 = vld [vmem:[#allocation7 + $0x30] sm:$0xff]  }
  0xd6   :  { %v1916_v42 = vsel %vm328_vm5, 1.0, %v3508_v6  ;;  %2169 = vmatpush3.bf16.msra.mxu0 %v2977_v54 }
  0xd7   :  { %v325_v41 = vpop.permute.xlu1 %324  ;;  %2170 = vmatprep.subr.bf16.mxu0 %v3508_v6 }
  0xd8   :  { %vm327_vm6 = vcmp.eq.s32.totalorder %v325_v41, 1  ;;  %v348_v44 = vpop.permute.xlu0 %347  ;;  %v3082_v41 = vld [vmem:[#allocation7 + $0x28] sm:$0xff]  }
  0xd9   :  { %vm329_vm7 = vmand %vm319_vm4, %vm327_vm6  ;;  %vm350_vm8 = vcmp.eq.s32.totalorder %v348_v44, 1  ;;  %v3093_v44 = vld [vmem:[#allocation7 + $0x10] sm:$0xff]  }
  0xda   :  { %v1917_v43 = vsel %vm329_vm7, 1.0, %v3508_v6  ;;  %2171 = vmatpush3.bf16.msra.mxu0 %v2986_v55 }
  0xdb   :  { %v2946_v45 = vpack.c.bf16 %v1917_v43, %v1916_v42  ;;  %2172 = vmatprep.subr.bf16.mxu0 %v3508_v6  ;;  %v3086_v42 = vld [vmem:[#allocation7 + $0x20] sm:$0xff]   ;;  %v3089_v43 = vld [vmem:[#allocation7 + $0x18] sm:$0xff]  }
  0xdc   :  { %v340_v46 = vpop.permute.xlu1 %339 }
  0xdd   :  { %vm342_vm9 = vcmp.eq.s32.totalorder %v2924_v24, %v340_v46  ;;  %2138 = vmatprep.mubr.msk.bf16.mxu0 %vm3513_vm2, %v2946_v45  ;;  %v3097_v46 = vld [vmem:[#allocation7 + $0x8] sm:$0xff]  }
  0xde   :  { %vm352_vm10 = vmand %vm342_vm9, %vm350_vm8  ;;  %2173 = vmatpush3.bf16.msra.mxu0 %v2992_v56 }
  0xdf   :  { %v1919_v48 = vsel %vm352_vm10, 1.0, %v3508_v6  ;;  %2174 = vmatprep.subr.bf16.mxu0 %v3508_v6 }
  0xe0   :  { %v345_v47 = vpop.permute.xlu1 %344 }
  0xe1   :  { %vm349_vm12 = vcmp.eq.s32.totalorder %v345_v47, 1  ;;  %v3101_v47 = vld [vmem:[#allocation7] sm:$0xff]  }
  0xe2   :  { %vm351_vm13 = vmand %vm341_vm11, %vm349_vm12  ;;  %2175 = vmatpush3.bf16.msra.mxu0 %v2999_v57 }
  0xe3   :  { %v1918_v49 = vsel %vm351_vm13, 1.0, %v3508_v6  ;;  %2176 = vmatprep.subr.bf16.mxu0 %v3508_v6 }
  0xe4   :  { %v2954_v50 = vpack.c.bf16 %v1919_v48, %v1918_v49 }
  0xe6   :  { %2139 = vmatmul.mubr.msk.bf16.gmra.mxu0 %vm3513_vm2, %v2954_v50 }
  0xe7   :  { %2182 = vmatprep.mubr.msk.bf16.mxu0 %vm3512_vm3, %v3508_v6  ;;  %2177 = vmatpush3.bf16.msra.mxu0 %v3007_v58 }
  0xe8   :  { %2178 = vmatprep.subr.bf16.mxu0 %v3508_v6 }
  0xeb   :  { %2179 = vmatpush3.bf16.msra.mxu0 %v3014_v59 }
  0xec   :  { %2180 = vmatprep.subr.bf16.mxu0 %v3508_v6 }
  0xef   :  { %2181 = vmatpush3.bf16.msra.mxu0 %v3021_v60 }
 0x107   :  { %v183_v3 = vpop.f32.mrf.mxu0 }
 0x108   :  { %v3024_v61 = vpop.f32.mrf.mxu1 }
 0x109   :  { %v3028_v4 = vpop.f32.mrf.mxu0 }
 0x10a   :  { %v2130_v62 = vpop.f32.mrf.mxu1 }
 0x10b   :  { %v187_v5 = vpop.f32.mrf.mxu0  ;;  %v1909_v62 = vld [vmem:[%s3491_s8] ss:$0 sm:$0xff] }
 0x10c   :  { %v3026_v63 = vpop.f32.mrf.mxu1 }
 0x10d   :  { %v3030_v7 = vpop.f32.mrf.mxu0 }
 0x10e   :  { %v2131_v2 = vpop.f32.mrf.mxu1 }
 0x191   :  { %v3032_v8 = vpop.f32.mrf.mxu0 }
 0x193   :  { %v3034_v9 = vpop.f32.mrf.mxu0 }
 0x194   :  { %v735_v26 = vadd.f32 %v3032_v8, %v3034_v9 }
 0x195   :  { %v3036_v10 = vpop.f32.mrf.mxu0 }
 0x196   :  { %v585_v22 = vpack.c.bf16 %v3036_v10, %v3032_v8 }
 0x197   :  { %v3038_v11 = vpop.f32.mrf.mxu0 }
 0x198   :  { %v584_v14 = vpack.c.bf16 %v3038_v11, %v3034_v9  ;;  %v736_v28 = vadd.f32 %v3036_v10, %v3038_v11 }
 0x19a   :  { %2158 = vmatprep.mubr.bf16.mxu1 %v584_v14  ;;  %v3109_v14 = vadd.f32 %v1909_v62, %v183_v3 }
 0x19b   :  { %2159 = vmatmul.mubr.bf16.vlgmr.msra.gmra.mxu1 %v585_v22 }
 0x19c   :  { %2187 = vmatpush3.bf16.msra.mxu1 %v3074_v39 }
 0x19d   :  { %2188 = vmatprep.subr.bf16.mxu1 %v3508_v6 }
 0x1a0   :  { %2189 = vmatpush3.bf16.msra.mxu1 %v3078_v40 }
 0x1a1   :  { %2190 = vmatprep.subr.bf16.mxu1 %v3508_v6 }
 0x1a4   :  { %2191 = vmatpush3.bf16.msra.mxu1 %v3082_v41 }
 0x1a5   :  { %2192 = vmatprep.subr.bf16.mxu1 %v3508_v6 }
 0x1a6   :  { %v3044_v23 = vpop.f32.mrf.mxu0 }
 0x1a8   :  { %v3046_v25 = vpop.f32.mrf.mxu0  ;;  %2193 = vmatpush3.bf16.msra.mxu1 %v3086_v42 }
 0x1a9   :  { %v755_v29 = vadd.f32 %v735_v26, %v3046_v25  ;;  %2194 = vmatprep.subr.bf16.mxu1 %v3508_v6  ;;  %v3111_v26 = vadd.f32 %v1909_v62, %v187_v5 }
 0x1aa   :  { %v3050_v27 = vpop.f32.mrf.mxu0 }
 0x1ab   :  { %v587_v34 = vpack.c.bf16 %v3050_v27, %v3044_v23  ;;  %v3063_v35 = vadd.f32 %v3044_v23, %v755_v29 }
 0x1ac   :  { %v3055_v30 = vpop.f32.mrf.mxu0  ;;  %2195 = vmatpush3.bf16.msra.mxu1 %v3089_v43 }
 0x1ad   :  { %v586_v32 = vpack.c.bf16 %v3055_v30, %v3046_v25  ;;  %v756_v33 = vadd.f32 %v736_v28, %v3055_v30  ;;  %2196 = vmatprep.subr.bf16.mxu1 %v3508_v6 }
 0x1af   :  { %v3066_v37 = vadd.f32 %v3050_v27, %v756_v33  ;;  %2162 = vmatprep.mubr.bf16.mxu1 %v586_v32 }
 0x1b0   :  { %2163 = vmatmul.mubr.bf16.gmra.mxu1 %v587_v34 }
 0x1b1   :  { %v781_v38 = vpack.c.bf16 %v3066_v37, %v3063_v35  ;;  %2202 = vmatprep.mubr.msk.bf16.mxu1 %vm3512_vm3, %v3508_v6  ;;  %2197 = vmatpush3.bf16.msra.mxu1 %v3093_v44 }
 0x1b2   :  { %2198 = vmatprep.subr.bf16.mxu1 %v3508_v6 }
 0x1b3   :  { %2183 = vmatmul.mubr.bf16.vlgmr.msra.gmra.mxu0 %v781_v38 }
 0x1b4   :  { %2208 = vmatprep.mubr.msk.bf16.mxu0 %vm3513_vm2, %v2931_v31 }
 0x1b5   :  { %2199 = vmatpush3.bf16.msra.mxu1 %v3097_v46 }
 0x1b6   :  { %2200 = vmatprep.subr.bf16.mxu1 %v3508_v6 }
 0x1b9   :  { %2201 = vmatpush3.bf16.msra.mxu1 %v3101_v47 }
 0x1ba   :  { %2240 = vmatprep.subr.bf16.mxu1 %v3508_v6 }
 0x25b   :  { %v2160_v48 = vpop.f32.mrf.mxu1 }
 0x25c   :  { %v721_v29 = vadd.f32 %v2160_v48, %v3109_v14 }
 0x25d   :  { %v670_v49 = vpop.f32.mrf.mxu1 }
 0x25e   :  { %v701_v28 = vadd.f32 %v670_v49, %v3109_v14  ;;  %v1942_v38 = vmul.f32 -1.442695, %v721_v29 }
 0x25f   :  { %v2161_v2 = vpop.f32.mrf.mxu1 }
 0x260   :  { %v722_v33 = vadd.f32 %v2161_v2, %v3111_v26  ;;  %v1940_v34 = vmul.f32 -1.442695, %v701_v28 }
 0x261   :  { %v673_v22 = vpop.f32.mrf.mxu1 }
 0x262   :  { %v702_v32 = vadd.f32 %v673_v22, %v3111_v26  ;;  %v1943_v13 = vmul.f32 -1.442695, %v722_v33  ;;  %2458 = vpow2.f32 %v1940_v34 }
 0x263   :  { %2460 = vpow2.f32 %v1942_v38 }
 0x264   :  { %v1941_v21 = vmul.f32 -1.442695, %v702_v32 }
 0x266   :  { %2462 = vpow2.f32 %v1941_v21 }
 0x267   :  { %2464 = vpow2.f32 %v1943_v13 }
 0x26f   :  { %v2459_v34 = vpop.eup %2458 }
 0x270   :  { %v2164_v12 = vpop.f32.mrf.mxu1  ;;  %v2461_v38 = vpop.eup %2460 }
 0x271   :  { %v761_v3 = vadd.f32 %v2164_v12, %v3109_v14  ;;  %v729_v1 = vadd.f32 1.0, %v2461_v38 }
 0x272   :  { %v686_v5 = vpop.f32.mrf.mxu1 }
 0x273   :  { %v1946_v62 = vmul.f32 -1.442695, %v761_v3  ;;  %v741_v49 = vadd.f32 %v686_v5, %v3109_v14  ;;  %v3119_v48 = vpop.f32.mrf.mxu0  ;;  %v2463_v3 = vpop.eup %2462 }
 0x274   :  { %v2165_v22 = vpop.f32.mrf.mxu1  ;;  %v2465_v5 = vpop.eup %2464 }
 0x275   :  { %v1944_v0 = vmul.f32 -1.442695, %v741_v49  ;;  %v762_v2 = vadd.f32 %v2165_v22, %v3111_v26  ;;  %v2184_v28 = vpop.f32.mrf.mxu0  ;;  %2466 = vpow2.f32 %v1946_v62  ;;  %v709_v49 = vadd.f32 1.0, %v2459_v34 }
 0x276   :  { %v689_v29 = vpop.f32.mrf.mxu1  ;;  %v710_v22 = vadd.f32 1.0, %v2463_v3  ;;  %v730_v28 = vadd.f32 1.0, %v2465_v5 }
 0x277   :  { %2468 = vpow2.f32 %v1944_v0  ;;  %v1947_v32 = vmul.f32 -1.442695, %v762_v2  ;;  %v742_v21 = vadd.f32 %v689_v29, %v3111_v26  ;;  %v3123_v33 = vpop.f32.mrf.mxu0 }
 0x279   :  { %2470 = vpow2.f32 %v1947_v32  ;;  %v1945_v12 = vmul.f32 -1.442695, %v742_v21  ;;  %v2185_v13 = vpop.f32.mrf.mxu0 }
 0x27b   :  { %2472 = vpow2.f32 %v1945_v12 }
 0x27c   :  { %2474 = vrcp.f32 %v709_v49 }
 0x27d   :  { %2476 = vrcp.f32 %v729_v1 }
 0x27e   :  { %2478 = vrcp.f32 %v710_v22 }
 0x27f   :  { %2480 = vrcp.f32 %v730_v28 }
 0x282   :  { %v2467_v62 = vpop.eup %2466 }
 0x283   :  { %v769_v2 = vadd.f32 1.0, %v2467_v62 }
 0x284   :  { %v2469_v0 = vpop.eup %2468 }
 0x285   :  { %v749_v29 = vadd.f32 1.0, %v2469_v0 }
 0x286   :  { %v2471_v6 = vpop.eup %2470 }
 0x287   :  { %2482 = vrcp.f32 %v749_v29  ;;  %v770_v32 = vadd.f32 1.0, %v2471_v6 }
 0x288   :  { %v2473_v21 = vpop.eup %2472  ;;  %2484 = vrcp.f32 %v769_v2 }
 0x289   :  { %v750_v12 = vadd.f32 1.0, %v2473_v21  ;;  %2486 = vrcp.f32 %v770_v32  ;;  %v2475_v13 = vpop.eup %2474 }
 0x28a   :  { %v2477_v34 = vpop.eup %2476  ;;  %v717_v5 = vmul.f32 %v2475_v13, %v3034_v9 }
 0x28b   :  { %2488 = vrcp.f32 %v750_v12  ;;  %v2479_v38 = vpop.eup %2478  ;;  %v737_v1 = vmul.f32 %v2477_v34, %v3032_v8 }
 0x28c   :  { %v2481_v3 = vpop.eup %2480  ;;  %v718_v22 = vmul.f32 %v2479_v38, %v3038_v11 }
 0x28d   :  { %v738_v0 = vmul.f32 %v2481_v3, %v3036_v10  ;;  %v739_v2 = vadd.f32 %v737_v1, %v717_v5 }
 0x28f   :  { %v740_v32 = vadd.f32 %v738_v0, %v718_v22 }
 0x294   :  { %v2483_v49 = vpop.eup %2482 }
 0x295   :  { %v757_v28 = vmul.f32 %v2483_v49, %v3046_v25  ;;  %v2485_v62 = vpop.eup %2484  ;;  %v3515_v25 = vmov 0.0  }
 0x296   :  { %v2487_v6 = vpop.eup %2486  ;;  %v777_v9 = vmul.f32 %v2485_v62, %v3044_v23 }
 0x297   :  { %v759_v12 = vadd.f32 %v757_v28, %v739_v2  ;;  %v778_v13 = vmul.f32 %v2487_v6, %v3050_v27 }
 0x298   :  { %v2489_v29 = vpop.eup %2488 }
 0x299   :  { %v758_v21 = vmul.f32 %v2489_v29, %v3055_v30  ;;  %v779_v8 = vadd.f32 %v777_v9, %v759_v12 }
 0x29b   :  { %v760_v24 = vadd.f32 %v758_v21, %v740_v32 }
 0x29d   :  { %v780_v34 = vadd.f32 %v778_v13, %v760_v24  ;;  %v1910_v24 = vld [vmem:[%s3489_s6] ss:$0 sm:$0xff] }
 0x29e   :  { %v3154_v10 = vadd.f32 %v1910_v24, %v3028_v4  ;;  %v3157_v23 = vadd.f32 %v1910_v24, %v3030_v7  ;;  %v1911_v4 = vld [vmem:[%s3493_s10] ss:$0 sm:$0xff] }
 0x29f   :  { %v885_v11 = vpack.c.bf16 %v780_v34, %v779_v8  ;;  %v3167_v7 = vadd.f32 %v1911_v4, %v3024_v61  ;;  %v3171_v62 = vadd.f32 %v1911_v4, %v3026_v63 }
 0x2a0   :  { %v871_v27 = vadd.f32 %v3119_v48, %v3154_v10  ;;  %v872_v30 = vadd.f32 %v3123_v33, %v3157_v23 }
 0x2a1   :  { %2203 = vmatmul.mubr.bf16.vlgmr.msra.gmra.mxu1 %v885_v11 }
 0x2a2   :  { %2241 = vmatpush3.bf16.msra.mxu1 %v2966_v52  ;;  %2256 = vmatprep.mubr.msk.bf16.mxu1 %vm3512_vm3, %v3515_v25  ;;  %v1956_v38 = vmul.f32 -1.442695, %v871_v27  ;;  %v1957_v3 = vmul.f32 -1.442695, %v872_v30 }
 0x2a3   :  { %2242 = vmatprep.subr.bf16.mxu1 %v3515_v25 }
 0x2a4   :  { %2490 = vpow2.f32 %v1956_v38 }
 0x2a5   :  { %2492 = vpow2.f32 %v1957_v3 }
 0x2a6   :  { %2243 = vmatpush3.bf16.msra.mxu1 %v2977_v54 }
 0x2a7   :  { %2244 = vmatprep.subr.bf16.mxu1 %v3515_v25 }
 0x2aa   :  { %2245 = vmatpush3.bf16.msra.mxu1 %v2986_v55 }
 0x2ab   :  { %2246 = vmatprep.subr.bf16.mxu1 %v3515_v25 }
 0x2ae   :  { %2247 = vmatpush3.bf16.msra.mxu1 %v2992_v56 }
 0x2af   :  { %2248 = vmatprep.subr.bf16.mxu1 %v3515_v25 }
 0x2b1   :  { %v2491_v5 = vpop.eup %2490 }
 0x2b2   :  { %2249 = vmatpush3.bf16.msra.mxu1 %v2999_v57  ;;  %v2493_v49 = vpop.eup %2492  ;;  %v879_v1 = vadd.f32 1.0, %v2491_v5 }
 0x2b3   :  { %2250 = vmatprep.subr.bf16.mxu1 %v3515_v25  ;;  %v880_v22 = vadd.f32 1.0, %v2493_v49 }
 0x2b4   :  { %2494 = vrcp.f32 %v879_v1 }
 0x2b5   :  { %2496 = vrcp.f32 %v880_v22 }
 0x2b6   :  { %2251 = vmatpush3.bf16.msra.mxu1 %v3007_v58 }
 0x2b7   :  { %2252 = vmatprep.subr.bf16.mxu1 %v3515_v25 }
 0x2ba   :  { %2253 = vmatpush3.bf16.msra.mxu1 %v3014_v59 }
 0x2bb   :  { %2254 = vmatprep.subr.bf16.mxu1 %v3515_v25 }
 0x2be   :  { %2255 = vmatpush3.bf16.msra.mxu1 %v3021_v60 }
 0x2c1   :  { %v2495_v29 = vpop.eup %2494 }
 0x2c2   :  { %v2497_v32 = vpop.eup %2496  ;;  %v979_v61 = vsub.f32 1.0, %v2495_v29 }
 0x2c3   :  { %v980_v12 = vsub.f32 1.0, %v2497_v32 }
 0x2c4   :  { %v981_v8 = vmul.f32 %v979_v61, %v3063_v35 }
 0x2c5   :  { %v982_v34 = vmul.f32 %v980_v12, %v3066_v37 }
 0x361   :  { %v968_v48 = vpop.f32.mrf.mxu1 }
 0x362   :  { %v975_v33 = vadd.f32 %v968_v48, %v3167_v7 }
 0x363   :  { %v2204_v28 = vpop.f32.mrf.mxu1 }
 0x364   :  { %2498 = vtanh.f32 %v975_v33 }
 0x365   :  { %v971_v6 = vpop.f32.mrf.mxu1 }
 0x366   :  { %v976_v0 = vadd.f32 %v971_v6, %v3171_v62 }
 0x367   :  { %v2205_v2 = vpop.f32.mrf.mxu1 }
 0x368   :  { %2500 = vtanh.f32 %v976_v0 }
 0x371   :  { %v2499_v21 = vpop.eup %2498 }
 0x372   :  { %v983_v9 = vmul.f32 %v2499_v21, %v2495_v29 }
 0x374   :  { %v985_v63 = vadd.f32 %v983_v9, %v981_v8 }
 0x375   :  { %v2501_v13 = vpop.eup %2500 }
 0x376   :  { %v984_v11 = vmul.f32 %v2501_v13, %v2497_v32 }
 0x378   :  { %v986_v24 = vadd.f32 %v984_v11, %v982_v34 }
 0x37a   :  { %v987_v27 = vpack.c.bf16 %v986_v24, %v985_v63 }
 0x37c   :  { %2206 = vmatprep.subr.bf16.mxu0 %v987_v27 }
 0x37d   :  { %2207 = vmatpush3.bf16.msra.mxu0 %v987_v27 }
 0x37e   :  { %2216 = vmatprep.subr.bf16.mxu0 %v2895_v15 }
 0x380   :  { %2209 = vmatmul.mubr.msk.bf16.vlgmr.msra.gmra.mxu0 %vm3513_vm2, %v2938_v36 }
 0x381   :  { %2212 = vmatprep.mubr.msk.bf16.mxu0 %vm3513_vm2, %v2946_v45  ;;  %2217 = vmatpush3.bf16.msra.mxu0 %v2895_v15 }
 0x382   :  { %2218 = vmatprep.subr.bf16.mxu0 %v2900_v16 }
 0x385   :  { %2219 = vmatpush3.bf16.msra.mxu0 %v2900_v16 }
 0x386   :  { %2220 = vmatprep.subr.bf16.mxu0 %v2906_v17 }
 0x388   :  { %2213 = vmatmul.mubr.msk.bf16.gmra.mxu0 %vm3513_vm2, %v2954_v50 }
 0x389   :  { %2221 = vmatpush3.bf16.msra.mxu0 %v2906_v17 }
 0x38a   :  { %2222 = vmatprep.subr.bf16.mxu0 %v2910_v18 }
 0x38d   :  { %2223 = vmatpush3.bf16.msra.mxu0 %v2910_v18 }
 0x38e   :  { %2224 = vmatprep.subr.bf16.mxu0 %v2915_v19 }
 0x391   :  { %2225 = vmatpush3.bf16.msra.mxu0 %v2915_v19 }
 0x392   :  { %2226 = vmatprep.subr.bf16.mxu0 %v2919_v20 }
 0x395   :  { %2227 = vmatpush3.bf16.msra.mxu0 %v2919_v20 }
 0x396   :  { %2228 = vmatprep.subr.bf16.mxu0 %v2960_v51 }
 0x399   :  { %2229 = vmatpush3.bf16.msra.mxu0 %v2960_v51 }
 0x39a   :  { %2230 = vmatprep.subr.bf16.mxu0 %v2970_v53 }
 0x39d   :  { %2231 = vmatpush3.bf16.msra.mxu0 %v2970_v53 }
 0x39e   :  { %2260 = vmatprep.subr.bf16.mxu0 %v3515_v25 }
 0x440   :  { %v3199_v35 = vpop.f32.mrf.mxu0 }
 0x442   :  { %v3201_v37 = vpop.f32.mrf.mxu0 }
 0x443   :  { %v1156_v1 = vadd.f32 %v3199_v35, %v3201_v37 }
 0x444   :  { %v3203_v30 = vpop.f32.mrf.mxu0 }
 0x445   :  { %v1054_v5 = vpack.c.bf16 %v3203_v30, %v3199_v35 }
 0x446   :  { %v3205_v38 = vpop.f32.mrf.mxu0 }
 0x447   :  { %v1053_v3 = vpack.c.bf16 %v3205_v38, %v3201_v37  ;;  %v1157_v48 = vadd.f32 %v3203_v30, %v3205_v38 }
 0x448   :  { %v3211_v49 = vpop.f32.mrf.mxu0 }
 0x449   :  { %2232 = vmatprep.mubr.bf16.mxu0 %v1053_v3 }
 0x44a   :  { %v3213_v4 = vpop.f32.mrf.mxu0  ;;  %2233 = vmatmul.mubr.bf16.vlgmr.msra.gmra.mxu0 %v1054_v5 }
 0x44b   :  { %2261 = vmatpush3.bf16.msra.mxu0 %v3074_v39  ;;  %v1176_v33 = vadd.f32 %v1156_v1, %v3213_v4 }
 0x44c   :  { %v3218_v22 = vpop.f32.mrf.mxu0  ;;  %2262 = vmatprep.subr.bf16.mxu0 %v3515_v25 }
 0x44d   :  { %v1056_v2 = vpack.c.bf16 %v3218_v22, %v3211_v49  ;;  %v3234_v29 = vadd.f32 %v3211_v49, %v1176_v33 }
 0x44e   :  { %v3224_v28 = vpop.f32.mrf.mxu0 }
 0x44f   :  { %v1055_v6 = vpack.c.bf16 %v3224_v28, %v3213_v4  ;;  %v1177_v0 = vadd.f32 %v1157_v48, %v3224_v28  ;;  %2263 = vmatpush3.bf16.msra.mxu0 %v3078_v40 }
 0x450   :  { %2264 = vmatprep.subr.bf16.mxu0 %v3515_v25 }
 0x451   :  { %v3237_v32 = vadd.f32 %v3218_v22, %v1177_v0  ;;  %2236 = vmatprep.mubr.bf16.mxu0 %v1055_v6 }
 0x452   :  { %2237 = vmatmul.mubr.bf16.gmra.mxu0 %v1056_v2 }
 0x453   :  { %v1202_v21 = vpack.c.bf16 %v3237_v32, %v3234_v29  ;;  %2265 = vmatpush3.bf16.msra.mxu0 %v3082_v41  ;;  %2276 = vmatprep.mubr.msk.bf16.mxu0 %vm3512_vm3, %v3515_v25 }
 0x454   :  { %2266 = vmatprep.subr.bf16.mxu0 %v3515_v25 }
 0x455   :  { %2257 = vmatmul.mubr.bf16.vlgmr.msra.gmra.mxu1 %v1202_v21 }
 0x456   :  { %2282 = vmatprep.mubr.msk.bf16.mxu1 %vm3513_vm2, %v2931_v31 }
 0x457   :  { %2267 = vmatpush3.bf16.msra.mxu0 %v3086_v42 }
 0x458   :  { %2268 = vmatprep.subr.bf16.mxu0 %v3515_v25 }
 0x45b   :  { %2269 = vmatpush3.bf16.msra.mxu0 %v3089_v43 }
 0x45c   :  { %2270 = vmatprep.subr.bf16.mxu0 %v3515_v25 }
 0x45f   :  { %2271 = vmatpush3.bf16.msra.mxu0 %v3093_v44 }
 0x460   :  { %2272 = vmatprep.subr.bf16.mxu0 %v3515_v25 }
 0x463   :  { %2273 = vmatpush3.bf16.msra.mxu0 %v3097_v46 }
 0x464   :  { %2274 = vmatprep.subr.bf16.mxu0 %v3515_v25 }
 0x467   :  { %2275 = vmatpush3.bf16.msra.mxu0 %v3101_v47 }
 0x468   :  { %2314 = vmatprep.subr.bf16.mxu0 %v3515_v25 }
 0x50a   :  { %v2234_v31 = vpop.f32.mrf.mxu0 }
 0x50b   :  { %v1142_v61 = vadd.f32 %v2234_v31, %v3109_v14 }
 0x50c   :  { %v1091_v12 = vpop.f32.mrf.mxu0 }
 0x50d   :  { %v1122_v9 = vadd.f32 %v1091_v12, %v3109_v14  ;;  %v1972_v13 = vmul.f32 -1.442695, %v1142_v61 }
 0x50e   :  { %v2235_v8 = vpop.f32.mrf.mxu0 }
 0x50f   :  { %v1970_v34 = vmul.f32 -1.442695, %v1122_v9  ;;  %v1143_v11 = vadd.f32 %v2235_v8, %v3111_v26 }
 0x510   :  { %v1094_v63 = vpop.f32.mrf.mxu0 }
 0x511   :  { %2502 = vpow2.f32 %v1970_v34  ;;  %v1973_v24 = vmul.f32 -1.442695, %v1143_v11  ;;  %v1123_v27 = vadd.f32 %v1094_v63, %v3111_v26 }
 0x512   :  { %2504 = vpow2.f32 %v1972_v13  ;;  %v2238_v3 = vpop.f32.mrf.mxu0 }
 0x513   :  { %v1971_v5 = vmul.f32 -1.442695, %v1123_v27  ;;  %v1182_v1 = vadd.f32 %v2238_v3, %v3109_v14  ;;  %2506 = vpow2.f32 %v1973_v24 }
 0x514   :  { %v1107_v48 = vpop.f32.mrf.mxu0 }
 0x515   :  { %2508 = vpow2.f32 %v1971_v5  ;;  %v1976_v33 = vmul.f32 -1.442695, %v1182_v1  ;;  %v1162_v6 = vadd.f32 %v1107_v48, %v3109_v14  ;;  %v3263_v0 = vpop.f32.mrf.mxu1 }
 0x516   :  { %v2239_v2 = vpop.f32.mrf.mxu0 }
 0x517   :  { %2510 = vpow2.f32 %v1976_v33  ;;  %v1974_v21 = vmul.f32 -1.442695, %v1162_v6  ;;  %v1183_v31 = vadd.f32 %v2239_v2, %v3111_v26  ;;  %v2258_v61 = vpop.f32.mrf.mxu1 }
 0x518   :  { %v1110_v12 = vpop.f32.mrf.mxu0 }
 0x519   :  { %2512 = vpow2.f32 %v1974_v21  ;;  %v1977_v9 = vmul.f32 -1.442695, %v1183_v31  ;;  %v1163_v13 = vadd.f32 %v1110_v12, %v3111_v26  ;;  %v3267_v8 = vpop.f32.mrf.mxu1 }
 0x51b   :  { %2514 = vpow2.f32 %v1977_v9  ;;  %v1975_v34 = vmul.f32 -1.442695, %v1163_v13  ;;  %v2259_v11 = vpop.f32.mrf.mxu1 }
 0x51d   :  { %2516 = vpow2.f32 %v1975_v34 }
 0x51e   :  { %v2503_v63 = vpop.eup %2502 }
 0x51f   :  { %v2505_v24 = vpop.eup %2504  ;;  %v1130_v3 = vadd.f32 1.0, %v2503_v63 }
 0x520   :  { %v2507_v27 = vpop.eup %2506  ;;  %v1150_v1 = vadd.f32 1.0, %v2505_v24 }
 0x521   :  { %v1151_v6 = vadd.f32 1.0, %v2507_v27  ;;  %2518 = vrcp.f32 %v1130_v3 }
 0x522   :  { %v2509_v5 = vpop.eup %2508  ;;  %2520 = vrcp.f32 %v1150_v1 }
 0x523   :  { %v1131_v48 = vadd.f32 1.0, %v2509_v5 }
 0x524   :  { %v2511_v33 = vpop.eup %2510 }
 0x525   :  { %2522 = vrcp.f32 %v1131_v48  ;;  %v1190_v21 = vadd.f32 1.0, %v2511_v33 }
 0x526   :  { %v2513_v2 = vpop.eup %2512  ;;  %2524 = vrcp.f32 %v1151_v6 }
 0x527   :  { %v1170_v31 = vadd.f32 1.0, %v2513_v2 }
 0x528   :  { %v2515_v61 = vpop.eup %2514 }
 0x529   :  { %2526 = vrcp.f32 %v1170_v31  ;;  %v1191_v12 = vadd.f32 1.0, %v2515_v61 }
 0x52a   :  { %v2517_v9 = vpop.eup %2516  ;;  %2528 = vrcp.f32 %v1190_v21 }
 0x52b   :  { %v1171_v13 = vadd.f32 1.0, %v2517_v9  ;;  %2530 = vrcp.f32 %v1191_v12 }
 0x52d   :  { %2532 = vrcp.f32 %v1171_v13 }
 0x52e   :  { %v2519_v34 = vpop.eup %2518 }
 0x52f   :  { %v2521_v11 = vpop.eup %2520  ;;  %v1138_v27 = vmul.f32 %v2519_v34, %v3201_v37 }
 0x530   :  { %v1158_v5 = vmul.f32 %v2521_v11, %v3199_v35 }
 0x532   :  { %v2523_v63 = vpop.eup %2522  ;;  %v1160_v21 = vadd.f32 %v1158_v5, %v1138_v27 }
 0x533   :  { %v2525_v24 = vpop.eup %2524  ;;  %v1139_v1 = vmul.f32 %v2523_v63, %v3205_v38 }
 0x534   :  { %v1159_v2 = vmul.f32 %v2525_v24, %v3203_v30 }
 0x536   :  { %v2527_v3 = vpop.eup %2526  ;;  %v1161_v61 = vadd.f32 %v1159_v2, %v1139_v1 }
 0x537   :  { %v1178_v48 = vmul.f32 %v2527_v3, %v3213_v4  ;;  %v2529_v33 = vpop.eup %2528 }
 0x538   :  { %v2531_v6 = vpop.eup %2530  ;;  %v1198_v37 = vmul.f32 %v2529_v33, %v3211_v49 }
 0x539   :  { %v1180_v9 = vadd.f32 %v1178_v48, %v1160_v21  ;;  %v1199_v34 = vmul.f32 %v2531_v6, %v3218_v22 }
 0x53a   :  { %v2533_v31 = vpop.eup %2532 }
 0x53b   :  { %v1179_v12 = vmul.f32 %v2533_v31, %v3224_v28  ;;  %v1200_v35 = vadd.f32 %v1198_v37, %v1180_v9 }
 0x53d   :  { %v1181_v13 = vadd.f32 %v1179_v12, %v1161_v61  ;;  %v2590_v61 = vld [vmem:[#allocation5 + $0x38] sm:$0xff]  }
 0x53f   :  { %v1201_v11 = vadd.f32 %v1199_v34, %v1181_v13 }
 0x541   :  { %v1258_v38 = vpack.c.bf16 %v1201_v11, %v1200_v35  ;;  %v3519_v11 = vmov 3  }
 0x543   :  { %2277 = vmatmul.mubr.bf16.vlgmr.msra.gmra.mxu0 %v1258_v38 }
 0x544   :  { %2315 = vmatpush3.bf16.msra.mxu0 %v2966_v52  ;;  %2330 = vmatprep.mubr.msk.bf16.mxu0 %vm3512_vm3, %v3515_v25  ;;  %v1244_v52 = vadd.f32 %v3263_v0, %v3154_v10 }
 0x545   :  { %2316 = vmatprep.subr.bf16.mxu0 %v3515_v25 }
 0x548   :  { %2317 = vmatpush3.bf16.msra.mxu0 %v2977_v54  ;;  %v1245_v54 = vadd.f32 %v3267_v8, %v3157_v23 }
 0x549   :  { %2318 = vmatprep.subr.bf16.mxu0 %v3515_v25 }
 0x54c   :  { %2319 = vmatpush3.bf16.msra.mxu0 %v2986_v55  ;;  %v1978_v55 = vmul.f32 -1.442695, %v1244_v52 }
 0x54d   :  { %2320 = vmatprep.subr.bf16.mxu0 %v3515_v25 }
 0x54e   :  { %2534 = vpow2.f32 %v1978_v55 }
 0x550   :  { %2321 = vmatpush3.bf16.msra.mxu0 %v2992_v56  ;;  %v1979_v56 = vmul.f32 -1.442695, %v1245_v54 }
 0x551   :  { %2322 = vmatprep.subr.bf16.mxu0 %v3515_v25 }
 0x552   :  { %2536 = vpow2.f32 %v1979_v56 }
 0x554   :  { %2323 = vmatpush3.bf16.msra.mxu0 %v2999_v57 }
 0x555   :  { %2324 = vmatprep.subr.bf16.mxu0 %v3515_v25 }
 0x558   :  { %2325 = vmatpush3.bf16.msra.mxu0 %v3007_v58 }
 0x559   :  { %2326 = vmatprep.subr.bf16.mxu0 %v3515_v25 }
 0x55b   :  { %v2535_v57 = vpop.eup %2534 }
 0x55c   :  { %2327 = vmatpush3.bf16.msra.mxu0 %v3014_v59  ;;  %v1252_v30 = vadd.f32 1.0, %v2535_v57 }
 0x55d   :  { %2328 = vmatprep.subr.bf16.mxu0 %v3515_v25 }
 0x55e   :  { %2538 = vrcp.f32 %v1252_v30 }
 0x55f   :  { %v2537_v58 = vpop.eup %2536 }
 0x560   :  { %2329 = vmatpush3.bf16.msra.mxu0 %v3021_v60  ;;  %v1253_v59 = vadd.f32 1.0, %v2537_v58 }
 0x561   :  { %2354 = vmatprep.subr.bf16.mxu0 %v3515_v25 }
 0x562   :  { %2540 = vrcp.f32 %v1253_v59 }
 0x56b   :  { %v2539_v8 = vpop.eup %2538 }
 0x56c   :  { %v1304_v27 = vsub.f32 1.0, %v2539_v8 }
 0x56e   :  { %v1306_v48 = vmul.f32 %v1304_v27, %v3234_v29  ;;  %v2591_v29 = vld [vmem:[#allocation5 + $0x30] sm:$0xff]  }
 0x56f   :  { %v2541_v63 = vpop.eup %2540 }
 0x570   :  { %v1305_v3 = vsub.f32 1.0, %v2541_v63 }
 0x572   :  { %v1307_v33 = vmul.f32 %v1305_v3, %v3237_v32 }
 0x603   :  { %v1293_v49 = vpop.f32.mrf.mxu0 }
 0x604   :  { %v1300_v60 = vadd.f32 %v1293_v49, %v3167_v7 }
 0x605   :  { %v2278_v4 = vpop.f32.mrf.mxu0 }
 0x606   :  { %2542 = vtanh.f32 %v1300_v60 }
 0x607   :  { %v1296_v22 = vpop.f32.mrf.mxu0 }
 0x608   :  { %v1301_v28 = vadd.f32 %v1296_v22, %v3171_v62 }
 0x609   :  { %v2279_v0 = vpop.f32.mrf.mxu0 }
 0x60a   :  { %2544 = vtanh.f32 %v1301_v28 }
 0x613   :  { %v2543_v24 = vpop.eup %2542 }
 0x614   :  { %v1308_v5 = vmul.f32 %v2543_v24, %v2539_v8 }
 0x616   :  { %v1310_v2 = vadd.f32 %v1308_v5, %v1306_v48 }
 0x617   :  { %v2545_v1 = vpop.eup %2544 }
 0x618   :  { %v1309_v6 = vmul.f32 %v2545_v1, %v2541_v63 }
 0x61a   :  { %v1311_v21 = vadd.f32 %v1309_v6, %v1307_v33 }
 0x61c   :  { %v1312_v31 = vpack.c.bf16 %v1311_v21, %v1310_v2 }
 0x61e   :  { %2280 = vmatprep.subr.bf16.mxu1 %v1312_v31 }
 0x61f   :  { %2281 = vmatpush3.bf16.msra.mxu1 %v1312_v31 }
 0x620   :  { %2290 = vmatprep.subr.bf16.mxu1 %v2895_v15 }
 0x622   :  { %2283 = vmatmul.mubr.msk.bf16.vlgmr.msra.gmra.mxu1 %vm3513_vm2, %v2938_v36 }
 0x623   :  { %2286 = vmatprep.mubr.msk.bf16.mxu1 %vm3513_vm2, %v2946_v45  ;;  %2291 = vmatpush3.bf16.msra.mxu1 %v2590_v61 }
 0x624   :  { %2292 = vmatprep.subr.bf16.mxu1 %v2900_v16 }
 0x627   :  { %2293 = vmatpush3.bf16.msra.mxu1 %v2591_v29 }
 0x628   :  { %2294 = vmatprep.subr.bf16.mxu1 %v2906_v17 }
 0x62a   :  { %2287 = vmatmul.mubr.msk.bf16.gmra.mxu1 %vm3513_vm2, %v2954_v50 }
 0x62b   :  { %2295 = vmatpush3.bf16.msra.mxu1 %v2906_v17 }
 0x62c   :  { %2296 = vmatprep.subr.bf16.mxu1 %v2910_v18 }
 0x62f   :  { %2297 = vmatpush3.bf16.msra.mxu1 %v2910_v18 }
 0x630   :  { %2298 = vmatprep.subr.bf16.mxu1 %v2915_v19 }
 0x633   :  { %2299 = vmatpush3.bf16.msra.mxu1 %v2915_v19 }
 0x634   :  { %2300 = vmatprep.subr.bf16.mxu1 %v2919_v20 }
 0x637   :  { %2301 = vmatpush3.bf16.msra.mxu1 %v2919_v20 }
 0x638   :  { %2302 = vmatprep.subr.bf16.mxu1 %v2960_v51 }
 0x63b   :  { %2303 = vmatpush3.bf16.msra.mxu1 %v2960_v51 }
 0x63c   :  { %2304 = vmatprep.subr.bf16.mxu1 %v2970_v53 }
 0x63f   :  { %2305 = vmatpush3.bf16.msra.mxu1 %v2970_v53 }
 0x640   :  { %2334 = vmatprep.subr.bf16.mxu1 %v3515_v25 }
 0x6e2   :  { %v3324_v15 = vpop.f32.mrf.mxu1 }
 0x6e4   :  { %v3326_v16 = vpop.f32.mrf.mxu1 }
 0x6e5   :  { %v1481_v50 = vadd.f32 %v3324_v15, %v3326_v16 }
 0x6e6   :  { %v3328_v17 = vpop.f32.mrf.mxu1 }
 0x6e7   :  { %v1379_v20 = vpack.c.bf16 %v3328_v17, %v3324_v15 }
 0x6e8   :  { %v3330_v18 = vpop.f32.mrf.mxu1 }
 0x6e9   :  { %v1378_v19 = vpack.c.bf16 %v3330_v18, %v3326_v16  ;;  %v1482_v53 = vadd.f32 %v3328_v17, %v3330_v18 }
 0x6ea   :  { %v3336_v36 = vpop.f32.mrf.mxu1 }
 0x6eb   :  { %2306 = vmatprep.mubr.bf16.mxu1 %v1378_v19 }
 0x6ec   :  { %v3338_v45 = vpop.f32.mrf.mxu1  ;;  %2307 = vmatmul.mubr.bf16.vlgmr.msra.gmra.mxu1 %v1379_v20 }
 0x6ed   :  { %2335 = vmatpush3.bf16.msra.mxu1 %v3074_v39  ;;  %v1501_v32 = vadd.f32 %v1481_v50, %v3338_v45 }
 0x6ee   :  { %v3343_v51 = vpop.f32.mrf.mxu1  ;;  %2336 = vmatprep.subr.bf16.mxu1 %v3515_v25 }
 0x6ef   :  { %v1381_v39 = vpack.c.bf16 %v3343_v51, %v3336_v36  ;;  %v3359_v37 = vadd.f32 %v3336_v36, %v1501_v32 }
 0x6f0   :  { %v3349_v12 = vpop.f32.mrf.mxu1 }
 0x6f1   :  { %v1380_v9 = vpack.c.bf16 %v3349_v12, %v3338_v45  ;;  %v1502_v13 = vadd.f32 %v1482_v53, %v3349_v12  ;;  %2337 = vmatpush3.bf16.msra.mxu1 %v3078_v40  ;;  %v120_v40 = vld [vmem:[%s3485_s2] sm:$0xff] }
 0x6f2   :  { %2338 = vmatprep.subr.bf16.mxu1 %v3515_v25  ;;  %359 = vperm.xlu1 %2414, %v120_v40   ;;  %vm366_vm14 = vcmp.ne.s32.totalorder %v120_v40, 0 }
 0x6f3   :  { %v3362_v34 = vadd.f32 %v3343_v51, %v1502_v13  ;;  %2310 = vmatprep.mubr.bf16.mxu1 %v1380_v9 }
 0x6f4   :  { %2311 = vmatmul.mubr.bf16.gmra.mxu1 %v1381_v39 }
 0x6f5   :  { %v1527_v35 = vpack.c.bf16 %v3362_v34, %v3359_v37  ;;  %2339 = vmatpush3.bf16.msra.mxu1 %v3082_v41  ;;  %2350 = vmatprep.mubr.msk.bf16.mxu1 %vm3512_vm3, %v3515_v25  ;;  %v121_v41 = vld [vmem:[%s3485_s2 + $0x8] sm:$0xff] }
 0x6f6   :  { %2340 = vmatprep.subr.bf16.mxu1 %v3515_v25  ;;  %362 = vperm.xlu0 %2415, %v121_v41   ;;  %vm367_vm15 = vcmp.ne.s32.totalorder %v121_v41, 0 }
 0x6f7   :  { %2331 = vmatmul.mubr.bf16.vlgmr.msra.gmra.mxu0 %v1527_v35 }
 0x6f8   :  { %2356 = vmatprep.mubr.msk.bf16.mxu0 %vm3512_vm3, %v3515_v25 }
 0x6f9   :  { %2341 = vmatpush3.bf16.msra.mxu1 %v3086_v42  ;;  %v3516_v42 = vmov 0  }
 0x6fa   :  { %2342 = vmatprep.subr.bf16.mxu1 %v3515_v25 }
 0x6fd   :  { %2343 = vmatpush3.bf16.msra.mxu1 %v3089_v43  ;;  %v368_v43 = vsel %vm366_vm14, 1, %v3516_v42 }
 0x6fe   :  { %2344 = vmatprep.subr.bf16.mxu1 %v3515_v25  ;;  %371 = vperm.xlu1 %2414, %v368_v43  }
 0x701   :  { %2345 = vmatpush3.bf16.msra.mxu1 %v3093_v44  ;;  %v3517_v44 = vmov 1  }
 0x702   :  { %2346 = vmatprep.subr.bf16.mxu1 %v3515_v25  ;;  %2416 = vset.pattern.permute.xlu0 %v3517_v44 }
 0x703   :  { %387 = vperm.xlu0 %2416, %v120_v40  }
 0x705   :  { %2347 = vmatpush3.bf16.msra.mxu1 %v3097_v46  ;;  %v369_v46 = vsel %vm367_vm15, 1, %v3516_v42 }
 0x706   :  { %2348 = vmatprep.subr.bf16.mxu1 %v3515_v25  ;;  %374 = vperm.xlu1 %2414, %v369_v46  }
 0x707   :  { %398 = vperm.xlu0 %2416, %v369_v46  }
 0x709   :  { %2349 = vmatpush3.bf16.msra.mxu1 %v3101_v47  ;;  %v3518_v47 = vmov 2  }
 0x70a   :  { %2380 = vmatprep.subr.bf16.mxu1 %v3515_v25  ;;  %2417 = vset.pattern.permute.xlu1 %v3517_v44 }
 0x70b   :  { %390 = vperm.xlu1 %2417, %v121_v41   ;;  %2419 = vset.pattern.permute.xlu0 %v3518_v47 }
 0x70c   :  { %414 = vperm.xlu0 %2419, %v121_v41  }
 0x70f   :  { %395 = vperm.xlu1 %2417, %v368_v43  }
 0x710   :  { %2420 = vset.pattern.permute.xlu0 %v3519_v11 }
 0x711   :  { %435 = vperm.xlu0 %2420, %v120_v40  }
 0x713   :  { %2418 = vset.pattern.permute.xlu1 %v3518_v47 }
 0x714   :  { %411 = vperm.xlu1 %2418, %v120_v40  }
 0x715   :  { %446 = vperm.xlu0 %2420, %v369_v46  }
 0x718   :  { %419 = vperm.xlu1 %2418, %v368_v43  }
 0x71c   :  { %422 = vperm.xlu1 %2418, %v369_v46  }
 0x720   :  { %2421 = vset.pattern.permute.xlu1 %v3519_v11 }
 0x721   :  { %438 = vperm.xlu1 %2421, %v121_v41  }
 0x725   :  { %443 = vperm.xlu1 %2421, %v368_v43  }
 0x7ac   :  { %v2308_v38 = vpop.f32.mrf.mxu1 }
 0x7ad   :  { %v1467_v52 = vadd.f32 %v2308_v38, %v3109_v14 }
 0x7ae   :  { %v1416_v54 = vpop.f32.mrf.mxu1 }
 0x7af   :  { %v1447_v55 = vadd.f32 %v1416_v54, %v3109_v14  ;;  %v1986_v56 = vmul.f32 -1.442695, %v1467_v52 }
 0x7b0   :  { %v2309_v57 = vpop.f32.mrf.mxu1 }
 0x7b1   :  { %v1984_v58 = vmul.f32 -1.442695, %v1447_v55  ;;  %v1468_v30 = vadd.f32 %v2309_v57, %v3111_v26 }
 0x7b2   :  { %v1419_v59 = vpop.f32.mrf.mxu1 }
 0x7b3   :  { %2546 = vpow2.f32 %v1984_v58  ;;  %v1987_v49 = vmul.f32 -1.442695, %v1468_v30  ;;  %v1448_v60 = vadd.f32 %v1419_v59, %v3111_v26 }
 0x7b4   :  { %2548 = vpow2.f32 %v1986_v56  ;;  %v2312_v4 = vpop.f32.mrf.mxu1 }
 0x7b5   :  { %v1985_v22 = vmul.f32 -1.442695, %v1448_v60  ;;  %v1507_v28 = vadd.f32 %v2312_v4, %v3109_v14  ;;  %2550 = vpow2.f32 %v1987_v49 }
 0x7b6   :  { %v1432_v0 = vpop.f32.mrf.mxu1 }
 0x7b7   :  { %2552 = vpow2.f32 %v1985_v22  ;;  %v1990_v8 = vmul.f32 -1.442695, %v1507_v28  ;;  %v1487_v63 = vadd.f32 %v1432_v0, %v3109_v14  ;;  %v3402_v24 = vpop.f32.mrf.mxu0 }
 0x7b8   :  { %v2313_v27 = vpop.f32.mrf.mxu1 }
 0x7b9   :  { %2554 = vpow2.f32 %v1990_v8  ;;  %v1988_v3 = vmul.f32 -1.442695, %v1487_v63  ;;  %v1508_v5 = vadd.f32 %v2313_v27, %v3111_v26  ;;  %v2332_v1 = vpop.f32.mrf.mxu0  ;;  %v1569_v8 = vadd.f32 %v3402_v24, %v3154_v10 }
 0x7ba   :  { %v1435_v48 = vpop.f32.mrf.mxu1 }
 0x7bb   :  { %2556 = vpow2.f32 %v1988_v3  ;;  %v1991_v33 = vmul.f32 -1.442695, %v1508_v5  ;;  %v1488_v6 = vadd.f32 %v1435_v48, %v3111_v26  ;;  %v1565_v2 = vpop.f32.mrf.mxu0 }
 0x7bc   :  { %v1570_v27 = vadd.f32 %v1565_v2, %v3157_v23 }
 0x7bd   :  { %2558 = vpow2.f32 %v1991_v33  ;;  %v1989_v21 = vmul.f32 -1.442695, %v1488_v6  ;;  %v2333_v31 = vpop.f32.mrf.mxu0 }
 0x7bf   :  { %2560 = vpow2.f32 %v1989_v21 }
 0x7c0   :  { %v2547_v61 = vpop.eup %2546 }
 0x7c1   :  { %v2549_v14 = vpop.eup %2548  ;;  %v1455_v19 = vadd.f32 1.0, %v2547_v61 }
 0x7c2   :  { %v2551_v29 = vpop.eup %2550  ;;  %v1475_v50 = vadd.f32 1.0, %v2549_v14 }
 0x7c3   :  { %v1476_v9 = vadd.f32 1.0, %v2551_v29  ;;  %2562 = vrcp.f32 %v1455_v19  ;;  %v3520_v19 = vld [vmem:[#allocation19_spill] sm:$0xff] }
 0x7c4   :  { %v2553_v20 = vpop.eup %2552  ;;  %2564 = vrcp.f32 %v1475_v50 }
 0x7c5   :  { %v1456_v53 = vadd.f32 1.0, %v2553_v20 }
 0x7c6   :  { %v2555_v32 = vpop.eup %2554 }
 0x7c7   :  { %2566 = vrcp.f32 %v1456_v53  ;;  %v1515_v39 = vadd.f32 1.0, %v2555_v32 }
 0x7c8   :  { %v2557_v13 = vpop.eup %2556  ;;  %2568 = vrcp.f32 %v1476_v9 }
 0x7c9   :  { %v1495_v26 = vadd.f32 1.0, %v2557_v13 }
 0x7ca   :  { %v2559_v35 = vpop.eup %2558 }
 0x7cb   :  { %2570 = vrcp.f32 %v1495_v26  ;;  %v1516_v40 = vadd.f32 1.0, %v2559_v35 }
 0x7cc   :  { %v2561_v41 = vpop.eup %2560  ;;  %2572 = vrcp.f32 %v1515_v39  ;;  %v3523_v39 = vlaneseq }
 0x7cd   :  { %v1496_v42 = vadd.f32 1.0, %v2561_v41  ;;  %2574 = vrcp.f32 %v1516_v40 }
 0x7ce   :  { %v1638_v26 = vshrl.u32 %v3523_v39, 7 }
 0x7cf   :  { %2576 = vrcp.f32 %v1496_v42 }
 0x7d0   :  { %v2563_v43 = vpop.eup %2562 }
 0x7d1   :  { %v2565_v44 = vpop.eup %2564  ;;  %v1463_v11 = vmul.f32 %v2563_v43, %v3326_v16 }
 0x7d2   :  { %v1483_v52 = vmul.f32 %v2565_v44, %v3324_v15 }
 0x7d4   :  { %v2567_v46 = vpop.eup %2566  ;;  %v1485_v30 = vadd.f32 %v1483_v52, %v1463_v11 }
 0x7d5   :  { %v2569_v47 = vpop.eup %2568  ;;  %v1464_v54 = vmul.f32 %v2567_v46, %v3330_v18 }
 0x7d6   :  { %v1484_v58 = vmul.f32 %v2569_v47, %v3328_v17 }
 0x7d8   :  { %v2571_v38 = vpop.eup %2570  ;;  %v1486_v49 = vadd.f32 %v1484_v58, %v1464_v54 }
 0x7d9   :  { %v1503_v55 = vmul.f32 %v2571_v38, %v3338_v45  ;;  %v2573_v56 = vpop.eup %2572  ;;  %v360_v45 = vpop.permute.xlu1 %359 }
 0x7da   :  { %v2575_v57 = vpop.eup %2574  ;;  %v1523_v16 = vmul.f32 %v2573_v56, %v3336_v36  ;;  %v1993_v36 = vmul.f32 -1.442695, %v1570_v27  ;;  %vm364_vm0 = vcmp.eq.s32.totalorder %v3520_v19, %v360_v45  ;;  %v2454_v27 = vld [vmem:[#allocation8 + $0x18] sm:$0xff]  }
 0x7db   :  { %v1505_v4 = vadd.f32 %v1503_v55, %v1485_v30  ;;  %v1524_v28 = vmul.f32 %v2575_v57, %v3343_v51  ;;  %v363_v51 = vpop.permute.xlu0 %362 }
 0x7dc   :  { %v2577_v59 = vpop.eup %2576  ;;  %vm365_vm5 = vcmp.eq.s32.totalorder %v3520_v19, %v363_v51 }
 0x7dd   :  { %v1504_v60 = vmul.f32 %v2577_v59, %v3349_v12  ;;  %v1525_v15 = vadd.f32 %v1523_v16, %v1505_v4  ;;  %v372_v17 = vpop.permute.xlu1 %371  ;;  %v1992_v12 = vmul.f32 -1.442695, %v1569_v8 }
 0x7de   :  { %vm376_vm1 = vcmp.eq.s32.totalorder %v372_v17, 1  ;;  %v2450_v17 = vld [vmem:[#allocation8 + $0x38] sm:$0xff]  }
 0x7df   :  { %v1506_v22 = vadd.f32 %v1504_v60, %v1486_v49  ;;  %2578 = vpow2.f32 %v1992_v12  ;;  %v388_v1 = vpop.permute.xlu0 %387  ;;  %vm3424_vm8 = vmand %vm364_vm0, %vm376_vm1  ;;  %v2453_v12 = vld [vmem:[#allocation8 + $0x20] sm:$0xff]  }
 0x7e0   :  { %2580 = vpow2.f32 %v1993_v36  ;;  %vm392_vm10 = vcmp.eq.s32.totalorder %v3520_v19, %v388_v1  ;;  %v1920_v42 = vsel %vm3424_vm8, 1.0, %v3515_v25  ;;  %v2455_v36 = vld [vmem:[#allocation8 + $0x10] sm:$0xff]   ;;  %v1693_v1 = vld [vmem:[%s3483_s0] sm:$0xff] }
 0x7e1   :  { %v1526_v0 = vadd.f32 %v1524_v28, %v1506_v22  ;;  %v375_v63 = vpop.permute.xlu1 %374 }
 0x7e2   :  { %vm377_vm4 = vcmp.eq.s32.totalorder %v375_v63, 1  ;;  %v2452_v63 = vld [vmem:[#allocation8 + $0x28] sm:$0xff]  }
 0x7e3   :  { %v1583_v18 = vpack.c.bf16 %v1526_v0, %v1525_v15  ;;  %v399_v31 = vpop.permute.xlu0 %398  ;;  %vm379_vm11 = vmand %vm365_vm5, %vm377_vm4 }
 0x7e4   :  { %vm401_vm7 = vcmp.eq.s32.totalorder %v399_v31, 1  ;;  %v1921_v43 = vsel %vm379_vm11, 1.0, %v3515_v25  ;;  %vm1807_vm11 = vcmask 1043456  }
 0x7e5   :  { %2351 = vmatmul.mubr.bf16.vlgmr.msra.gmra.mxu1 %v1583_v18  ;;  %v391_v3 = vpop.permute.xlu1 %390 }
 0x7e6   :  { %2382 = vmatprep.mubr.msk.bf16.mxu1 %vm3512_vm3, %v3515_v25  ;;  %vm393_vm6 = vcmp.eq.s32.totalorder %v3520_v19, %v391_v3  ;;  %v1696_v3 = vld [vmem:[%s3494_s11] sm:$0xf]  ;;  %s2757_s11 = smov [#allocation12]  }
 0x7e7   :  { %v415_v10 = vpop.permute.xlu0 %414  ;;  %vm403_vm12 = vmand %vm393_vm6, %vm401_vm7  ;;  %v1809_v51 = vsel %vm1807_vm11, %v1696_v3, 0 }
 0x7e8   :  { %vm417_vm3 = vcmp.eq.s32.totalorder %v3520_v19, %v415_v10  ;;  %v1923_v46 = vsel %vm403_vm12, 1.0, %v3515_v25  ;;  %2381 = vmatpush3.bf16.msra.mxu1 %v1809_v51  ;;  %vm1803_vm12 = vcmask 64512  }
 0x7e9   :  { %v396_v5 = vpop.permute.xlu1 %395  ;;  %v409_v38 = vadd.f32 %v1923_v46, %v1921_v43 }
 0x7ea   :  { %vm400_vm9 = vcmp.eq.s32.totalorder %v396_v5, 1  ;;  %v2456_v5 = vld [vmem:[#allocation8 + $0x8] sm:$0xff]  }
 0x7eb   :  { %v436_v50 = vpop.permute.xlu0 %435  ;;  %vm402_vm13 = vmand %vm392_vm10, %vm400_vm9  ;;  %vm1640_vm9 = vcmp.ne.s32.totalorder %v1638_v26, 0  ;;  %vm3525_vm10 = vmmov 0  }
 0x7ec   :  { %v2579_v33 = vpop.eup %2578  ;;  %v1922_v44 = vsel %vm402_vm13, 1.0, %v3515_v25  ;;  %vm440_vm6 = vcmp.eq.s32.totalorder %v3520_v19, %v436_v50  ;;  %v3444_v58 = vsel %vm1640_vm9, 1.0, %v3515_v25 }
 0x7ed   :  { %v412_v48 = vpop.permute.xlu1 %411  ;;  %v1577_v6 = vadd.f32 1.0, %v2579_v33  ;;  %v2581_v21 = vpop.eup %2580  ;;  %v408_v11 = vadd.f32 %v1922_v44, %v1920_v42 }
 0x7ee   :  { %v1578_v14 = vadd.f32 1.0, %v2581_v21  ;;  %vm416_vm14 = vcmp.eq.s32.totalorder %v3520_v19, %v412_v48  ;;  %v1694_v48 = vld [vmem:[%s3483_s0 + $0x8] sm:$0xff]  ;;  %s1886_s0 = sshll.u32 %s2757_s11, 4  ;;  %s1887_s0 = int_to_ptr.vmem [resolvable:$true] %s1886_s0 }
 0x7ef   :  { %2582 = vrcp.f32 %v1577_v6  ;;  %v1695_v33 = vpack.c.bf16 %v1694_v48, %v1693_v1  ;;  %v2457_v6 = vld [vmem:[#allocation8] sm:$0xff]   ;;  %s2692_s25 = scalar_lea.vmem %s1887_s0, 256  ;;  %p2697_p12 = scmp.lt.s32.totalorder %s1887_s0, %s1887_s0 }
 0x7f0   :  { %2584 = vrcp.f32 %v1578_v14  ;;  %p2693_p11 = scmp.ne.s32.totalorder %s1887_s0, %s2692_s25  ;;  %p2698_p13 = scmp.lt.s32.totalorder %s2692_s25, %s2692_s25 }
 0x7f1   :  { %v420_v61 = vpop.permute.xlu1 %419  ;;  %2383 = vmatmul.mubr.msk.bf16.vlgmr.msra.gmra.mxu1 %vm1803_vm12, %v1695_v33 }
 0x7f2   :  { %vm424_vm15 = vcmp.eq.s32.totalorder %v420_v61, 1  ;;  %p2699_p0 = por %p2698_p13, %p2697_p12 }
 0x7f3   :  { %vm426_vm0 = vmand %vm416_vm14, %vm424_vm15 }
 0x7f4   :  { %v1924_v54 = vsel %vm426_vm0, 1.0, %v3515_v25  ;;  %p2700_p1 = pnand %p2699_p0, %p2693_p11 }
 0x7f5   :  { %v423_v24 = vpop.permute.xlu1 %422  ;;  %v432_v49 = vadd.f32 %v1924_v54, %v408_v11 }
 0x7f6   :  { %vm425_vm2 = vcmp.eq.s32.totalorder %v423_v24, 1 }
 0x7f7   :  { %vm427_vm1 = vmand %vm417_vm3, %vm425_vm2  ;;  %vm3524_vm3 = vcmask 130048  }
 0x7f8   :  { %v1925_v55 = vsel %vm427_vm1, 1.0, %v3515_v25 }
 0x7f9   :  { %v439_v32 = vpop.permute.xlu1 %438  ;;  %v433_v60 = vadd.f32 %v1925_v55, %v409_v38 }
 0x7fa   :  { %vm441_vm4 = vcmp.eq.s32.totalorder %v3520_v19, %v439_v32 }
 0x7fd   :  { %v444_v35 = vpop.permute.xlu1 %443 }
 0x7fe   :  { %vm448_vm7 = vcmp.eq.s32.totalorder %v444_v35, 1 }
 0x7ff   :  { %vm450_vm2 = vmand %vm440_vm6, %vm448_vm7 }
 0x800   :  { %v1926_v16 = vsel %vm450_vm2, 1.0, %v3515_v25 }
 0x801   :  { %v456_v18 = vadd.f32 %v1926_v16, %v432_v49 }
 0x8a5   :  { %v1618_v29 = vpop.f32.mrf.mxu1 }
 0x8a6   :  { %v1625_v23 = vadd.f32 %v1618_v29, %v3167_v7  ;;  %v2583_v7 = vpop.eup %2582 }
 0x8a7   :  { %v2352_v2 = vpop.f32.mrf.mxu1  ;;  %v1629_v40 = vsub.f32 1.0, %v2583_v7  ;;  %v2585_v41 = vpop.eup %2584 }
 0x8a8   :  { %2586 = vtanh.f32 %v1625_v23  ;;  %v1630_v52 = vsub.f32 1.0, %v2585_v41 }
 0x8a9   :  { %v1621_v20 = vpop.f32.mrf.mxu1  ;;  %v1631_v56 = vmul.f32 %v1629_v40, %v3359_v37 }
 0x8aa   :  { %v1626_v53 = vadd.f32 %v1621_v20, %v3171_v62  ;;  %v447_v62 = vpop.permute.xlu0 %446  ;;  %v1632_v4 = vmul.f32 %v1630_v52, %v3362_v34  ;;  %v2451_v34 = vld [vmem:[#allocation8 + $0x30] sm:$0xff]  }
 0x8ab   :  { %v2353_v9 = vpop.f32.mrf.mxu1  ;;  %vm449_vm5 = vcmp.eq.s32.totalorder %v447_v62, 1 }
 0x8ac   :  { %2588 = vtanh.f32 %v1626_v53  ;;  %vm451_vm8 = vmand %vm441_vm4, %vm449_vm5 }
 0x8ad   :  { %v1927_v22 = vsel %vm451_vm8, 1.0, %v3515_v25 }
 0x8ae   :  { %v457_v37 = vadd.f32 %v1927_v22, %v433_v60 }
 0x8b0   :  { %v458_v8 = vpack.c.bf16 %v457_v37, %v456_v18 }
 0x8b1   :  { %v1845_v24 = vpop.f32.mrf.mxu1 }
 0x8b3   :  { %v2384_v29 = vpop.f32.mrf.mxu1 }
 0x8b5   :  { %v2587_v47 = vpop.eup %2586  ;;  %v1848_v23 = vpop.f32.mrf.mxu1 }
 0x8b6   :  { %v1633_v57 = vmul.f32 %v2587_v47, %v2583_v7 }
 0x8b7   :  { %v2385_v2 = vpop.f32.mrf.mxu1 }
 0x8b8   :  { %v1635_v30 = vadd.f32 %v1633_v57, %v1631_v56 }
 0x8b9   :  { %v2589_v59 = vpop.eup %2588 }
 0x8ba   :  { %v1634_v28 = vmul.f32 %v2589_v59, %v2585_v41  ;;  %v1646_v15 = vmul.f32 %v3444_v58, %v1635_v30 }
 0x8bc   :  { %v1636_v0 = vadd.f32 %v1634_v28, %v1632_v4  ;;  %1867 = vst [vmem:[#allocation12] sm:$0xff] %v1646_v15 }
 0x8be   :  { %v1648_v45 = vpack.c.bf16 %v1636_v0, %v1646_v15  ;;  %1868 = vst [vmem:[#allocation12 + $0x8] sm:$0xff] %v1636_v0 }
 0x8c0   :  { %2355 = vmatpush3.bf16.msra.mxu0 %v1648_v45 }
 0x8c1   :  { %2360 = vmatprep.subr.bf16.mxu0 %v3515_v25 }
 0x8c3   :  { %2357 = vmatmul.mubr.msk.bf16.vlgmr.msra.gmra.mxu0 %vm3524_vm3, %v458_v8 }
 0x8c4   :  { %2361 = vmatpush3.bf16.msra.mxu0 %v2450_v17  ;;  %2376 = vmatprep.mubr.msk.bf16.mxu0 %vm3525_vm10, %v3515_v25 }
 0x8c5   :  { %2362 = vmatprep.subr.bf16.mxu0 %v3515_v25 }
 0x8c8   :  { %2363 = vmatpush3.bf16.msra.mxu0 %v2451_v34 }
 0x8c9   :  { %2364 = vmatprep.subr.bf16.mxu0 %v3515_v25 }
 0x8cc   :  { %2365 = vmatpush3.bf16.msra.mxu0 %v2452_v63 }
 0x8cd   :  { %2366 = vmatprep.subr.bf16.mxu0 %v3515_v25 }
 0x8d0   :  { %2367 = vmatpush3.bf16.msra.mxu0 %v2453_v12 }
 0x8d1   :  { %2368 = vmatprep.subr.bf16.mxu0 %v3515_v25 }
 0x8d4   :  { %2369 = vmatpush3.bf16.msra.mxu0 %v2454_v27 }
 0x8d5   :  { %2370 = vmatprep.subr.bf16.mxu0 %v3515_v25 }
 0x8d8   :  { %2371 = vmatpush3.bf16.msra.mxu0 %v2455_v36 }
 0x8d9   :  { %2372 = vmatprep.subr.bf16.mxu0 %v3515_v25 }
 0x8dc   :  { %2373 = vmatpush3.bf16.msra.mxu0 %v2456_v5 }
 0x8dd   :  { %2374 = vmatprep.subr.bf16.mxu0 %v3515_v25 }
 0x8e0   :  { %2375 = vmatpush3.bf16.msra.mxu0 %v2457_v6 }
 0x983   :  { %v1686_v21 = vpop.f32.mrf.mxu0 }
 0x985   :  { %v2358_v31 = vpop.f32.mrf.mxu0 }
 0x987   :  { %v1689_v61 = vpop.f32.mrf.mxu0 }
 0x988   :  { %v1697_v14 = vpack.c.bf16 %v1689_v61, %v1686_v21 }
 0x989   :  { %v2359_v10 = vpop.f32.mrf.mxu0 }
 0x98a   :  { %2377 = vmatmul.mubr.bf16.vlgmr.msra.gmra.mxu0 %v1697_v14 }
 0x98b   :  { %2703 = shalt.err (!%p2700_p1)
}
 0x98c   :  { %s2758_s27 = smov 128   ;;  %s2759_s12 = smov 8   ;;  %v2005_v19 = vld [vmem:[#allocation10] ss:$0 sm:$0xff] }
 0x98d   :  { %1892 = dma.vmem_to_hbm [thread:$0]  %s1887_s0, 256, %s3498_s15, [#allocation13], %s2758_s27, %s2758_s27, %s2759_s12  }
 0x98e   :  { %s2760_s4 = smov [#allocation11]  }
 0x98f   :  { %s1874_s28 = sshll.u32 %s2760_s4, 4  ;;  %s1875_s28 = int_to_ptr.vmem [resolvable:$true] %s1874_s28 }
 0x990   :  { %s2712_s30 = scalar_lea.vmem %s1875_s28, 256  ;;  %p2717_p3 = scmp.lt.s32.totalorder %s1875_s28, %s1875_s28 }
 0x991   :  { %p2713_p2 = scmp.ne.s32.totalorder %s1875_s28, %s2712_s30  ;;  %p2718_p4 = scmp.lt.s32.totalorder %s2712_s30, %s2712_s30 }
 0x993   :  { %p2719_p5 = por %p2718_p4, %p2717_p3 }
 0x995   :  { %p2720_p6 = pnand %p2719_p5, %p2713_p2 }
 0xa4a   :  { %v1796_v25 = vpop.f32.mrf.mxu0 }
 0xa4b   :  { %v1846_v20 = vadd.f32 %v1845_v24, %v1796_v25 }
 0xa4c   :  { %v2378_v50 = vpop.f32.mrf.mxu0 }
 0xa4d   :  { %v1859_v53 = vadd.f32 %v2005_v19, %v1846_v20 }
 0xa4e   :  { %v1799_v32 = vpop.f32.mrf.mxu0 }
 0xa4f   :  { %v1861_v9 = vmax.f32 %v1859_v53, 0.0  ;;  %v1849_v13 = vadd.f32 %v1848_v23, %v1799_v32 }
 0xa50   :  { %v2379_v7 = vpop.f32.mrf.mxu0 }
 0xa51   :  { %v1863_v62 = vmul.f32 %v3444_v58, %v1861_v9  ;;  %v1860_v39 = vadd.f32 %v2005_v19, %v1849_v13 }
 0xa53   :  { %1865 = vst [vmem:[#allocation11] sm:$0xff] %v1863_v62  ;;  %v1862_v26 = vmax.f32 %v1860_v39, 0.0 }
 0xa55   :  { %1866 = vst [vmem:[#allocation11 + $0x8] sm:$0xff] %v1862_v26 }
 0xa56   :  { %2723 = shalt.err (!%p2720_p6)
}
 0xa57   :  { %1880 = dma.vmem_to_hbm [thread:$0]  %s1875_s28, 256, %s3497_s14, [#allocation4], %s2758_s27, %s2758_s27, %s2759_s12  }
 0xa58   :  { %2738 = dma.done.wait [#allocation4], 256  }
 0xa59   :  { %2739 = vsyncadd [#allocation4], 4294967040 }
 0xa5a   :  { %2740 = dma.done.wait [#allocation13], 256  }
 0xa5b   :  { %2741 = vsyncadd [#allocation13], 4294967040 }
 0xa5c   :  { %1899 = vsyncpa [#allocation3], 1 }
 0xa5d   :  { %1900 = vsyncpa [#allocation6], 1 }
 0xa5e   :  { %1901 = vsyncpa [#allocation9], 1 }
 0xa5f   :  { %1902 = vsyncpa [#allocation4], 1 }
 0xa60   :  { %1903 = vsyncpa [#allocation13], 1 }

</bundles_post_ra>
